<compile_context>
chip_gen: v5e
topology: v5e:2x2
jax: 0.10.0
libtpu: 0.0.40
codegen_flags: <defaults>
</compile_context>

<pallas_src>
import functools

import jax
import jax.numpy as jnp
from jax.experimental import pallas as pl
from jax.experimental.pallas import tpu as pltpu


def _pos_emb_2d_kernel(rowc_ref, col_ref, b_ref, a_ref, out_ref):
    """out[r, c, :] = sin(rowc[r] * B + A) + COL[c, :], cast to the output dtype.

    rowc_ref : (tr, 1, 1)   scaled row coordinates for this tile
    col_ref  : (1, w, dim)  precomputed [sin(col*f) | cos(col*f) | 0 | 0]
    b_ref    : (1, 1, dim)  [0 | 0 | inv_freq | inv_freq]
    a_ref    : (1, 1, dim)  [0 | 0 | 0 | pi/2]   (cos(x) = sin(x + pi/2))
    out_ref  : (tr, w, dim)
    """
    # Narrow (tr, 1, dim) slab of transcendentals; column-half lanes give sin(0) = 0.
    row_vals = jnp.sin(rowc_ref[...] * b_ref[...] + a_ref[...])
    # Broadcast the row half across w (sublanes) and the column constant across tr
    # (leading dim), add in f32, cast only at the store.
    out_ref[...] = (row_vals + col_ref[...]).astype(out_ref.dtype)


def _round_up(x, m):
    return ((x + m - 1) // m) * m


def _pick_row_tile(h, f32_slice_bytes, target_bytes=3 * 1024 * 1024):
    """Rows per block: ~target_bytes of f32 compute footprint, but always >= 2 grid
    steps when h >= 2 so the parallel row axis shards across the two v7x cores."""
    tr_cap = max(1, target_bytes // max(1, f32_slice_bytes))
    n_steps = -(-h // tr_cap)
    if h >= 2:
        n_steps = max(n_steps, 2)
    return -(-h // n_steps)


@functools.lru_cache(maxsize=64)
def _get_cached_emb(dtype_name, h, w, dim, scale, base_size):
    if dim % 4 != 0:
        raise Exception("dim must be divisible by 4")
    dtype = jnp.dtype(dtype_name)
    q = dim // 4
    half = dim // 2

    # Buffer init, identical to the torch module's register_buffer.
    inv_freq = 1.0 / (
        10000.0 ** (jnp.arange(0, half, 2, dtype=jnp.float32) / half)
    )                                                            # (q,)

    # Scaled grid coordinates (same op order as the torch reference).
    col_coords = jnp.arange(w, dtype=jnp.float32) / scale        # (w,)
    row_coords = jnp.arange(h, dtype=jnp.float32) / scale        # (h,)
    if base_size is not None:
        col_coords = col_coords * (base_size / w)
        row_coords = row_coords * (base_size / h)

    # Channel layout per sequence position (matches torch concat([emb_h, emb_w])):
    #   [ sin(col*f) | cos(col*f) | sin(row*f) | cos(row*f) ]   (q channels each)
    # Column half is row-invariant -> precomputed once (exact sin/cos), zeros elsewhere.
    ang_c = col_coords[:, None] * inv_freq[None, :]               # (w, q)
    col_const = jnp.concatenate(
        [jnp.sin(ang_c), jnp.cos(ang_c), jnp.zeros((w, half), jnp.float32)],
        axis=-1,
    ).reshape(1, w, dim)
    # Row-half lane constants for the in-kernel FMA + sin.
    zq = jnp.zeros((q,), jnp.float32)
    b_vec = jnp.concatenate([zq, zq, inv_freq, inv_freq]).reshape(1, 1, dim)
    a_vec = jnp.concatenate(
        [zq, zq, zq, jnp.full((q,), jnp.pi / 2, jnp.float32)]
    ).reshape(1, 1, dim)
    rowc = row_coords.reshape(h, 1, 1)

    # --- Tiling: rows per block sized against the f32 compute footprint. ---
    out_bytes = dtype.itemsize
    sub_pack = {4: 8, 2: 16, 1: 32}.get(out_bytes, 8)   # sublane packing per dtype
    dim_pad = _round_up(dim, 128)
    f32_slice = _round_up(w, 8) * dim_pad * 4           # one output row, f32, padded
    out_slice = _round_up(w, sub_pack) * dim_pad * out_bytes
    tr = _pick_row_tile(h, f32_slice)
    grid = (-(-h // tr),)

    # Scoped-VMEM request: double-buffered output + a few full-size f32 elementwise
    # temporaries + constants, with slack.  Stays well under v7x's 64 MiB physical
    # VMEM and overrides v5e's 16 MiB default when needed.
    est = (2 * tr * out_slice + 4 * tr * f32_slice + 2 * f32_slice
           + 2 * tr * 8 * 128 * 4 + 4 * 8 * dim_pad * 4 + 4 * 1024 * 1024)
    vmem_limit = min(56 * 1024 * 1024, max(32 * 1024 * 1024, int(est)))

    out3d = pl.pallas_call(
        _pos_emb_2d_kernel,
        out_shape=jax.ShapeDtypeStruct((h, w, dim), dtype),
        grid_spec=pltpu.PrefetchScalarGridSpec(
            num_scalar_prefetch=0,
            grid=grid,
            in_specs=[
                pl.BlockSpec((tr, 1, 1), lambda i: (i, 0, 0)),     # row coords
                pl.BlockSpec((1, w, dim), lambda i: (0, 0, 0)),    # column constant
                pl.BlockSpec((1, 1, dim), lambda i: (0, 0, 0)),    # row freqs
                pl.BlockSpec((1, 1, dim), lambda i: (0, 0, 0)),    # row phase
            ],
            out_specs=pl.BlockSpec((tr, w, dim), lambda i: (i, 0, 0)),
        ),
        compiler_params=pltpu.CompilerParams(
            dimension_semantics=("parallel",),
            vmem_limit_bytes=vmem_limit,
        ),
    )(rowc, col_const, b_vec, a_vec)

    # (h, w, dim) row-major is exactly (h*w, dim); this reshape is free.
    return out3d.reshape(1, h * w, dim)


def position_embedding_2d(x, h, w, dim, scale=1.0, base_size=None):
    """Equivalent of PositionEmbedding2D(dim).forward(x, h, w, scale, base_size).

    Returns a (1, h*w, dim) array with dtype == x.dtype.  As in the PyTorch module,
    x is consulted only for its dtype and results are cached per configuration.
    """
    return _get_cached_emb(
        jnp.dtype(x.dtype).name,
        int(h),
        int(w),
        int(dim),
        float(scale),
        None if base_size is None else float(base_size),
    )


def _reference(h, w, dim, dtype, scale=1.0, base_size=None):
    """Pure-JAX transcription of the PyTorch module (for verification)."""
    half_dim = dim // 2
    inv_freq = 1.0 / (
        10000.0 ** (jnp.arange(0, half_dim, 2, dtype=jnp.float32) / half_dim)
    )
    grid_h = jnp.arange(h, dtype=jnp.float32) / scale
    grid_w = jnp.arange(w, dtype=jnp.float32) / scale
    if base_size is not None:
        grid_h = grid_h * (base_size / h)
        grid_w = grid_w * (base_size / w)
    gh, gw = jnp.meshgrid(grid_w, grid_h, indexing="ij")
    gh = gh.T.reshape(-1)   # column coordinate per flat seq index
    gw = gw.T.reshape(-1)   # row coordinate per flat seq index

    def sincos(t):
        ang = jnp.einsum("i,d->id", t, inv_freq)
        return jnp.concatenate([jnp.sin(ang), jnp.cos(ang)], axis=-1)

    emb = jnp.concatenate([sincos(gh), sincos(gw)], axis=-1)
    return emb[None].astype(dtype)


if __name__ == "__main__":
    key = jax.random.PRNGKey(0)
    # x only supplies dtype, as in the PyTorch module.
    batch, seq, hidden = 2, 8, 32
    x = jax.random.normal(key, (batch, seq, hidden), dtype=jnp.float32)

    configs = [
        dict(h=16, w=16, dim=32, scale=1.0, base_size=None),
        dict(h=16, w=8, dim=32, scale=2.0, base_size=12),   # rectangular + base_size
        dict(h=6, w=10, dim=16, scale=1.5, base_size=8),    # odd h / w, small dim
    ]
    for cfg in configs:
        out = jax.block_until_ready(position_embedding_2d(x, **cfg))
        ref = _reference(cfg["h"], cfg["w"], cfg["dim"], x.dtype,
                         cfg["scale"], cfg["base_size"])
        assert out.shape == (1, cfg["h"] * cfg["w"], cfg["dim"]), out.shape
        assert out.dtype == x.dtype, out.dtype
        assert jnp.allclose(out, ref, rtol=1e-5, atol=2e-5), f"mismatch vs reference for {cfg}"

    # bf16 output path (dtype taken from x, cast happens at the store).
    x_bf16 = x.astype(jnp.bfloat16)
    out_bf = jax.block_until_ready(position_embedding_2d(x_bf16, 16, 16, 32))
    ref_bf = _reference(16, 16, 32, jnp.bfloat16)
    assert out_bf.dtype == jnp.bfloat16
    assert jnp.allclose(out_bf.astype(jnp.float32), ref_bf.astype(jnp.float32),
                        atol=2e-2), "bf16 mismatch vs reference"

    print("KERNEL_OK")
</pallas_src>

<mosaic_0001>
module attributes {stable_mosaic.version = 11 : i64} {
  func.func @_pos_emb_2d_kernel(%arg0: i32, %arg1: memref<8x1x1xf32, #tpu.memory_space<vmem>>, %arg2: memref<1x16x32xf32, #tpu.memory_space<vmem>>, %arg3: memref<1x1x32xf32, #tpu.memory_space<vmem>>, %arg4: memref<1x1x32xf32, #tpu.memory_space<vmem>>, %arg5: memref<8x16x32xf32, #tpu.memory_space<vmem>>) attributes {dimension_semantics = [#tpu.dimension_semantics<parallel>], iteration_bounds = array<i64: 2>, scalar_prefetch = 0 : i64, scratch_operands = 0 : i64, tpu.core_type = #tpu.core_type<tc>, window_params = [{transform_indices = @transform_0, window_bounds = array<i64: 8, 1, 1>}, {pipeline_mode = #tpu.pipeline_mode<synchronous>, transform_indices = @transform_1, window_bounds = array<i64: 1, 16, 32>}, {pipeline_mode = #tpu.pipeline_mode<synchronous>, transform_indices = @transform_2, window_bounds = array<i64: 1, 1, 32>}, {pipeline_mode = #tpu.pipeline_mode<synchronous>, transform_indices = @transform_3, window_bounds = array<i64: 1, 1, 32>}, {transform_indices = @transform_4, window_bounds = array<i64: 8, 16, 32>}]} {
    %c0 = arith.constant 0 : index
    %c0_0 = arith.constant 0 : index
    %c0_1 = arith.constant 0 : index
    %0 = vector.load %arg1[%c0, %c0_0, %c0_1] : memref<8x1x1xf32, #tpu.memory_space<vmem>>, vector<8x1x1xf32>
    %c0_2 = arith.constant 0 : index
    %c0_3 = arith.constant 0 : index
    %c0_4 = arith.constant 0 : index
    %1 = vector.load %arg3[%c0_2, %c0_3, %c0_4] : memref<1x1x32xf32, #tpu.memory_space<vmem>>, vector<1x1x32xf32>
    %2 = vector.broadcast %0 : vector<8x1x1xf32> to vector<8x1x32xf32>
    %3 = vector.broadcast %1 : vector<1x1x32xf32> to vector<8x1x32xf32>
    %4 = arith.mulf %2, %3 : vector<8x1x32xf32>
    %c0_5 = arith.constant 0 : index
    %c0_6 = arith.constant 0 : index
    %c0_7 = arith.constant 0 : index
    %5 = vector.load %arg4[%c0_5, %c0_6, %c0_7] : memref<1x1x32xf32, #tpu.memory_space<vmem>>, vector<1x1x32xf32>
    %6 = vector.broadcast %5 : vector<1x1x32xf32> to vector<8x1x32xf32>
    %7 = arith.addf %4, %6 : vector<8x1x32xf32>
    %8 = math.sin %7 : vector<8x1x32xf32>
    %c0_8 = arith.constant 0 : index
    %c0_9 = arith.constant 0 : index
    %c0_10 = arith.constant 0 : index
    %9 = vector.load %arg2[%c0_8, %c0_9, %c0_10] : memref<1x16x32xf32, #tpu.memory_space<vmem>>, vector<1x16x32xf32>
    %10 = vector.broadcast %8 : vector<8x1x32xf32> to vector<8x16x32xf32>
    %11 = vector.broadcast %9 : vector<1x16x32xf32> to vector<8x16x32xf32>
    %12 = arith.addf %10, %11 : vector<8x16x32xf32>
    %c0_11 = arith.constant 0 : index
    %c0_12 = arith.constant 0 : index
    %c0_13 = arith.constant 0 : index
    %13 = vector.load %arg5[%c0_11, %c0_12, %c0_13] : memref<8x16x32xf32, #tpu.memory_space<vmem>>, vector<8x16x32xf32>
    tpu.vector_store %arg5[%c0_11, %c0_12, %c0_13], %12 {strides = array<i32>} : memref<8x16x32xf32, #tpu.memory_space<vmem>>, vector<8x16x32xf32>,
    return
  }
  func.func @transform_0(%arg0: i32) -> (i32, i32, i32) {
    %c0_i32 = arith.constant 0 : i32
    %c0_i32_0 = arith.constant 0 : i32
    %c0_i32_1 = arith.constant 0 : i32
    return %arg0, %c0_i32, %c0_i32_0 : i32, i32, i32
  }
  func.func @transform_1(%arg0: i32) -> (i32, i32, i32) {
    %c0_i32 = arith.constant 0 : i32
    %c0_i32_0 = arith.constant 0 : i32
    %c0_i32_1 = arith.constant 0 : i32
    %c0_i32_2 = arith.constant 0 : i32
    return %c0_i32, %c0_i32_0, %c0_i32_1 : i32, i32, i32
  }
  func.func @transform_2(%arg0: i32) -> (i32, i32, i32) {
    %c0_i32 = arith.constant 0 : i32
    %c0_i32_0 = arith.constant 0 : i32
    %c0_i32_1 = arith.constant 0 : i32
    %c0_i32_2 = arith.constant 0 : i32
    return %c0_i32, %c0_i32_0, %c0_i32_1 : i32, i32, i32
  }
  func.func @transform_3(%arg0: i32) -> (i32, i32, i32) {
    %c0_i32 = arith.constant 0 : i32
    %c0_i32_0 = arith.constant 0 : i32
    %c0_i32_1 = arith.constant 0 : i32
    %c0_i32_2 = arith.constant 0 : i32
    return %c0_i32, %c0_i32_0, %c0_i32_1 : i32, i32, i32
  }
  func.func @transform_4(%arg0: i32) -> (i32, i32, i32) {
    %c0_i32 = arith.constant 0 : i32
    %c0_i32_0 = arith.constant 0 : i32
    %c0_i32_1 = arith.constant 0 : i32
    return %arg0, %c0_i32, %c0_i32_0 : i32, i32, i32
  }
}

</mosaic_0001>

<bundles_post_ra>
// kernel: tpu_custom_call.1
= control target key start
LH: loop header
LB: loop body
LE: loop exit
PB: predicated region body
PF: predicated region fallthrough
CT: control target
= control target key end

     0   :  { %9 = vsyncpa [#allocation3], 0  ;;  %s3010_s0 = inlined_call_operand.vmem [shape: f32[16,1,1], index: 0, kind: input, shape index: {}]   ;;  %s3011_s1 = inlined_call_operand.vmem [shape: f32[1,16,32], index: 1, kind: input, shape index: {}]   ;;  %s3012_s2 = inlined_call_operand.vmem [shape: f32[1,1,32], index: 2, kind: input, shape index: {}]   ;;  %s3013_s3 = inlined_call_operand.vmem [shape: f32[1,1,32], index: 3, kind: input, shape index: {}]   ;;  %s3014_s4 = inlined_call_operand.hbm [shape: f32[16,16,32], index: 4, kind: output, shape index: {}]  }
   0x1   :  { %11 = vsyncpa [#allocation3 + $0x1], 0  ;;  %s1834_s15 = smov 0   ;;  %s1836_s16 = smov 0  }
   0x2   :  { %s1838_s17 = smov 0   ;;  %s1840_s18 = smov 0  }
   0x3 LB: > { %s1855_s19 = sadd.s32 4294967295, %s1798_s18   ;;  %s1645_s20 = sadd.s32 4294967294, %s1798_s18   ;;  %s1798_s18 = sphi %s1840_s18, %s3083_s18   ;;  %s1794_s17 = sphi %s1838_s17, %s3082_s17   ;;  %s1790_s16 = sphi %s1836_s16, %s3081_s16   ;;  %s1786_s15 = sphi %s1834_s15, %s3080_s15  }
   0x4   : > { %s1859_s21 = sadd.s32 1, %s1798_s18   ;;  %s113_s22 = sadd.s32 1, %s1794_s17 }
   0x5   : > { %s110_s23 = ssub.s32 %s1798_s18, %s1859_s21  ;;  %p123_p0 = scmp.ne.s32.totalorder %s1794_s17, %s1790_s16 }
   0x6   : > { %p111_p1 = scmp.eq.s32.totalorder %s110_s23, 0  ;;  %p124_p2 = scmp.eq.s32.totalorder %s1855_s19, 1 }
   0x7   : > { %p129_p3 = scmp.ne.s32.totalorder %s1790_s16, %s1786_s15  ;;  %p130_p4 = scmp.eq.s32.totalorder %s1645_s20, 1 }
   0x8   : > { %s1870_s24 = scalar_select %p111_p1, %s1794_s17, %s113_s22  }
   0x9   : > { %p1872_p5 = por %p124_p2, %p123_p0  ;;  %p1876_p6 = por %p130_p4, %p129_p3 }
   0xa   : > { %p1648_p7 = scmp.ge.s32.totalorder %s1798_s18, 1  ;;  %p165_p8 = scmp.lt.s32.totalorder %s1798_s18, 3 }
   0xc   : > { %p166_p9 = pnand %p1648_p7, %p165_p8 }
   0xe   : > { %169 = sbr.rel (%p166_p9) target bundleno = 493 (0x1ed), region = 36 }
  0x13   : > { %s1650_s27 = sshll.u32 %s1855_s19, 3  ;;  %v3030_v0 = vmov 0   ;;  %v1892_v12 = vld [vmem:[%s3012_s2] sm:$0x1]  ;;  %v3025_v45 = vmov 683565275  }
  0x14   : > { %1733 = vset.pattern.permute.xlu2 %v3030_v0  ;;  %1732 = vset.pattern.permute.xlu1 %v3030_v0  ;;  %p191_p10 = scmp.lt.s32.totalorder %s1650_s27, 15  ;;  %v1898_v14 = vld [vmem:[%s3013_s3] sm:$0x1]  ;;  %v3027_v47 = vmov 2475754826   ;;  %s187_s13 = sand.u32 1, %s1790_s16  }
  0x15   : > { %1731 = vset.pattern.permute.xlu0 %v3030_v0  ;;  %v3020_v51 = vmov 2131351028   ;;  %v3023_v54 = vmov 2102212464   ;;  %v3018_v57 = vmov 920167782  }
  0x16   : > { %s3085_s27 = smov (!%p191_p10, %s1650_s27), 15  ;;  %v3016_v60 = vmov 1326507024   ;;  %s2825_s14 = sshll.u32 %s187_s13, 7 }
  0x17   : > { %s193_s30 = scalar_lea.vmem %s3010_s0, %s3085_s27  ;;  %s2857_s28 = scalar_lea.vmem [#allocation2], %s2825_s14 }
  0x18   : > { %v200_v1 = vld [vmem:[%s193_s30 + $0x4] sm:$0x1]  ;;  %v198_v2 = vld [vmem:[%s193_s30 + $0x2] sm:$0x1]  ;;  %v196_v3 = vld [vmem:[%s193_s30] sm:$0x1] }
  0x19   : > { %231 = vperm.xlu2 %1733, %v200_v1   ;;  %219 = vperm.xlu1 %1732, %v198_v2   ;;  %v201_v4 = vld [vmem:[%s193_s30 + $0x5] sm:$0x1]  ;;  %v199_v5 = vld [vmem:[%s193_s30 + $0x3] sm:$0x1]  ;;  %v197_v6 = vld [vmem:[%s193_s30 + $0x1] sm:$0x1] }
  0x1a   : > { %207 = vperm.xlu0 %1731, %v196_v3   ;;  %v203_v7 = vld [vmem:[%s193_s30 + $0x7] sm:$0x1]  ;;  %v202_v8 = vld [vmem:[%s193_s30 + $0x6] sm:$0x1]  ;;  %s1682_s29 = sshll.u32 %s1855_s19, 7  ;;  %s1583_s7 = sshll.u32 %s2857_s28, 4  ;;  %s1584_s7 = int_to_ptr.vmem [resolvable:$true] %s1583_s7 }
  0x1b   : > { %s1582_s6 = scalar_lea.hbm %s3014_s4, %s1682_s29  ;;  %s1570_s8 = scalar_lea.sflag [#allocation3], %s187_s13 }
  0x1c   : > { %s1585_s19 = sshll.u32 %s1582_s6, 4  ;;  %s1756_s14 = scalar_lea.hbm %s3014_s4, 256  ;;  %s1586_s19 = int_to_ptr.hbm [resolvable:$true] %s1585_s19 }
  0x1d   : > { %s1750_s9 = sshra.s32 %s1586_s19, 4  ;;  %s1751_s9 = int_to_ptr.hbm [resolvable:$true] %s1750_s9 }
  0x1e   : > { %s1752_s10 = scalar_lea.hbm %s1751_s9, 128  ;;  %p1757_p0 = scmp.lt.s32.totalorder %s1751_s9, %s3014_s4 }
  0x1f   : > { %p1753_p11 = scmp.ne.s32.totalorder %s1751_s9, %s1752_s10  ;;  %p1758_p1 = scmp.lt.s32.totalorder %s1756_s14, %s1752_s10 }
  0x21   : > { %237 = vperm.xlu2 %1733, %v201_v4   ;;  %225 = vperm.xlu1 %1732, %v199_v5   ;;  %p1754_p12 = pnand %p1753_p11, %p1872_p5  ;;  %p1759_p2 = por %p1758_p1, %p1757_p0 }
  0x22   : > { %213 = vperm.xlu0 %1731, %v197_v6  }
  0x23   : > { %p1755_p13 = pneg %p1754_p12 }
  0x25   : > { %p1760_p3 = pnand %p1759_p2, %p1755_p13 }
  0x29   : > { %249 = vperm.xlu1 %1732, %v203_v7  }
  0x2a   : > { %243 = vperm.xlu0 %1731, %v202_v8  }
  0x8b   : > { %v220_v9 = vpop.permute.xlu1 %219 }
  0x8c   : > { %v208_v10 = vpop.permute.xlu0 %207  ;;  %v222_v16 = vperm.slane %v220_v9, 0 }
  0x8d   : > { %v210_v11 = vperm.slane %v208_v10, 0 }
  0x8e   : > { %v255_v24 = vmul.f32 %v222_v16, %v1892_v12 }
  0x8f   : > { %v253_v13 = vmul.f32 %v210_v11, %v1892_v12 }
  0x90   : > { %v1915_v30 = vadd.f32 %v1898_v14, %v255_v24 }
  0x91   : > { %v1901_v15 = vadd.f32 %v1898_v14, %v253_v13 }
  0x92   : > { %3042 = vst [vmem:[#allocation6_spill] sm:$0xff] %v1915_v30  ;;  %v583_v39 = vand.u32 2139095040, %v1915_v30 }
  0x93   : > { %v1903_v17 = vpop.permute.xlu1 %225  ;;  %v270_v18 = vand.u32 2147483647, %v1901_v15  ;;  %v273_v19 = vand.u32 2139095040, %v1901_v15 }
  0x94   : > { %v214_v20 = vpop.permute.xlu0 %213 }
  0x95   : > { %v216_v21 = vperm.slane %v214_v20, 0  ;;  %v274_v22 = vshrl.u32 %v273_v19, 23  ;;  %v277_v23 = vand.u32 8388607, %v270_v18 }
  0x97   : > { %v254_v25 = vmul.f32 %v216_v21, %v1892_v12  ;;  %v1651_v26 = vadd.s32 4294967169, %v274_v22  ;;  %v278_v27 = vor.u32 8388608, %v277_v23 }
  0x99   : > { %v1912_v28 = vadd.f32 %v1898_v14, %v254_v25  ;;  %v280_v29 = vadd.s32 1, %v1651_v26  ;;  %v1917_v31 = vshll.u32 %v278_v27, 8 }
  0x9b   : > { %3041 = vst [vmem:[#allocation5_spill] sm:$0xff] %v1912_v28  ;;  %v250_v32 = vpop.permute.xlu1 %249  ;;  %vm281_vm0 = vcmp.gt.s32.totalorder %v280_v29, 0  ;;  %v428_v35 = vand.u32 2139095040, %v1912_v28  ;;  %v1922_v38 = vand.u32 65535, %v1917_v31  ;;  %v320_v42 = vshrl.u32 %v1917_v31, 16 }
  0x9c   : > { %v252_v33 = vperm.slane %v250_v32, 0  ;;  %v282_v34 = vsel %vm281_vm0, %v280_v29, 0  ;;  %v425_v43 = vand.u32 2147483647, %v1912_v28  ;;  %v584_v32 = vshrl.u32 %v583_v39, 23 }
  0x9d   : > { %v284_v36 = vand.u32 31, %v282_v34  ;;  %v283_v40 = vshrl.u32 %v282_v34, 5  ;;  %v429_v49 = vshrl.u32 %v428_v35, 23 }
  0x9e   : > { %v260_v37 = vmul.f32 %v252_v33, %v1892_v12  ;;  %v1943_v2 = vand.u32 8388607, %v425_v43 }
  0x9f   : > { %v285_v41 = vsub.s32 32, %v284_v36  ;;  %v287_v46 = vshll.u32 %v3025_v45, %v284_v36  ;;  %v290_v48 = vshll.u32 %v3027_v47, %v284_v36  ;;  %v293_v53 = vshll.u32 %v3020_v51, %v284_v36 }
  0xa0   : > { %v1928_v44 = vadd.f32 %v1898_v14, %v260_v37  ;;  %v296_v55 = vshll.u32 %v3023_v54, %v284_v36  ;;  %v299_v59 = vshll.u32 %v3018_v57, %v284_v36  ;;  %vm302_vm1 = vcmp.lt.s32.totalorder %v283_v40, 1 }
  0xa1   : > { %v288_v50 = vshrl.u32 %v3027_v47, %v285_v41  ;;  %v291_v52 = vshrl.u32 %v3020_v51, %v285_v41  ;;  %v294_v56 = vshrl.u32 %v3023_v54, %v285_v41  ;;  %v297_v58 = vshrl.u32 %v3018_v57, %v285_v41 }
  0xa2   : > { %3043 = vst [vmem:[#allocation7_spill] sm:$0xff] %v1928_v44  ;;  %v300_v61 = vshrl.u32 %v3016_v60, %v285_v41  ;;  %v286_v62 = vshrl.u32 %v3025_v45, %v285_v41  ;;  %vm304_vm2 = vcmp.lt.s32.totalorder %v283_v40, 3  ;;  %vm305_vm3 = vcmp.lt.s32.totalorder %v283_v40, 4 }
  0xa3   : > { %v289_v63 = vor.u32 %v288_v50, %v287_v46  ;;  %v292_v1 = vor.u32 %v291_v52, %v290_v48  ;;  %v295_v3 = vor.u32 %v294_v56, %v293_v53  ;;  %v298_v4 = vor.u32 %v297_v58, %v296_v55 }
  0xa4   : > { %v301_v5 = vor.u32 %v300_v61, %v299_v59  ;;  %v1654_v7 = vadd.s32 4294967169, %v429_v49  ;;  %vm303_vm4 = vcmp.lt.s32.totalorder %v283_v40, 2  ;;  %v433_v29 = vor.u32 8388608, %v1943_v2 }
  0xa5   : > { %v310_v6 = vsel %vm302_vm1, %v289_v63, %v292_v1  ;;  %v307_v8 = vsel %vm305_vm3, %v295_v3, 2102212464  ;;  %v311_v9 = vsel %vm305_vm3, %v298_v4, 920167782  ;;  %v314_v10 = vsel %vm302_vm1, %v292_v1, %v295_v3 }
  0xa6   : > { %v315_v11 = vsel %vm305_vm3, %v301_v5, 1326507024  ;;  %v312_v13 = vsel %vm304_vm2, %v295_v3, %v311_v9  ;;  %v435_v19 = vadd.s32 1, %v1654_v7  ;;  %v306_v20 = vsel %vm302_vm1, %v286_v62, %v289_v63 }
  0xa7   : > { %v316_v16 = vsel %vm304_vm2, %v298_v4, %v315_v11  ;;  %v308_v21 = vsel %vm304_vm2, %v292_v1, %v307_v8  ;;  %v313_v22 = vsel %vm303_vm4, %v310_v6, %v312_v13 }
  0xa8   : > { %v317_v23 = vsel %vm303_vm4, %v314_v10, %v316_v16  ;;  %v343_v26 = vand.u32 65535, %v313_v22  ;;  %v344_v27 = vshrl.u32 %v313_v22, 16  ;;  %v1946_v33 = vsel %vm303_vm4, %v306_v20, %v308_v21 }
  0xa9   : > { %v321_v24 = vand.u32 65535, %v317_v23  ;;  %v322_v25 = vshrl.u32 %v317_v23, 16  ;;  %vm436_vm5 = vcmp.gt.s32.totalorder %v435_v19, 0 }
  0xaa   : > { %v346_v40 = vmul.u32 %v344_v27, %v1922_v38  ;;  %v347_v41 = vmul.u32 %v343_v26, %v320_v42  ;;  %v345_v49 = vmul.u32 %v343_v26, %v1922_v38  ;;  %v348_v50 = vmul.u32 %v344_v27, %v320_v42 }
  0xab   : > { %v324_v34 = vmul.u32 %v322_v25, %v1922_v38  ;;  %v325_v35 = vmul.u32 %v321_v24, %v320_v42  ;;  %v323_v36 = vmul.u32 %v321_v24, %v1922_v38  ;;  %v326_v37 = vmul.u32 %v322_v25, %v320_v42 }
  0xac   : > { %v349_v39 = vshll.u32 %v346_v40, 16  ;;  %v350_v55 = vshrl.u32 %v346_v40, 16  ;;  %v351_v58 = vshll.u32 %v347_v41, 16  ;;  %v437_v59 = vsel %vm436_vm5, %v435_v19, 0 }
  0xad   : > { %v327_v46 = vshll.u32 %v324_v34, 16  ;;  %v328_v48 = vshrl.u32 %v324_v34, 16  ;;  %v329_v52 = vshll.u32 %v325_v35, 16  ;;  %v330_v53 = vshrl.u32 %v325_v35, 16 }
  0xae   : > { %v352_v62 = vshrl.u32 %v347_v41, 16  ;;  %vm353_vm7 = vc.u32 %v345_v49, %v349_v39  ;;  %v355_v63 = vadd.s32 %v349_v39, %v345_v49  ;;  %v439_v38 = vand.u32 31, %v437_v59 }
  0xaf   : > { %vm331_vm6 = vc.u32 %v323_v36, %v327_v46  ;;  %v333_v56 = vadd.s32 %v327_v46, %v323_v36  ;;  %v354_v2 = vsel %vm353_vm7, 1, %v3030_v0  ;;  %v1956_v4 = vshrl.u32 %v437_v59, 5 }
  0xb0   : > { %v332_v61 = vsel %vm331_vm6, 1, %v3030_v0  ;;  %v356_v3 = vadd.s32 %v354_v2, %v348_v50  ;;  %vm357_vm9 = vc.u32 %v355_v63, %v351_v58  ;;  %v1959_v7 = vadd.s32 %v355_v63, %v351_v58 }
  0xb1   : > { %v334_v1 = vadd.s32 %v332_v61, %v326_v37  ;;  %vm335_vm8 = vc.u32 %v333_v56, %v329_v52  ;;  %v358_v6 = vsel %vm357_vm9, 1, %v3030_v0  ;;  %v440_v8 = vsub.s32 32, %v439_v38 }
  0xb2   : > { %v336_v42 = vsel %vm335_vm8, 1, %v3030_v0  ;;  %v360_v9 = vadd.s32 %v358_v6, %v356_v3  ;;  %v442_v10 = vshll.u32 %v3025_v45, %v439_v38  ;;  %v445_v11 = vshll.u32 %v3027_v47, %v439_v38 }
  0xb3   : > { %v338_v5 = vadd.s32 %v336_v42, %v334_v1  ;;  %v448_v13 = vshll.u32 %v3020_v51, %v439_v38  ;;  %v443_v19 = vshrl.u32 %v3027_v47, %v440_v8  ;;  %v446_v20 = vshrl.u32 %v3020_v51, %v440_v8 }
  0xb4   : > { %v451_v21 = vshll.u32 %v3023_v54, %v439_v38  ;;  %v361_v22 = vadd.s32 %v360_v9, %v350_v55  ;;  %v449_v23 = vshrl.u32 %v3023_v54, %v440_v8  ;;  %v452_v24 = vshrl.u32 %v3018_v57, %v440_v8 }
  0xb5   : > { %v339_v16 = vadd.s32 %v338_v5, %v328_v48  ;;  %v454_v25 = vshll.u32 %v3018_v57, %v439_v38  ;;  %v444_v27 = vor.u32 %v443_v19, %v442_v10  ;;  %v447_v34 = vor.u32 %v446_v20, %v445_v11 }
  0xb6   : > { %v455_v35 = vshrl.u32 %v3016_v60, %v440_v8  ;;  %v362_v36 = vadd.s32 %v361_v22, %v352_v62  ;;  %v450_v37 = vor.u32 %v449_v23, %v448_v13  ;;  %v453_v40 = vor.u32 %v452_v24, %v451_v21 }
  0xb7   : > { %v1970_v26 = vadd.s32 %v339_v16, %v330_v53  ;;  %v1975_v46 = vshll.u32 %v433_v29, 8  ;;  %v1657_v48 = vadd.s32 4294967169, %v584_v32  ;;  %v363_v49 = vmul.u32 %v1917_v31, %v1946_v33 }
  0xb8   : > { %v456_v41 = vor.u32 %v455_v35, %v454_v25  ;;  %v366_v50 = vadd.s32 1, %v362_v36  ;;  %vm457_vm11 = vcmp.lt.s32.totalorder %v1956_v4, 1  ;;  %vm460_vm12 = vcmp.lt.s32.totalorder %v1956_v4, 4 }
  0xb9   : > { %vm365_vm10 = vc.u32 %v1970_v26, %v1959_v7  ;;  %vm459_vm13 = vcmp.lt.s32.totalorder %v1956_v4, 3  ;;  %v465_v52 = vsel %vm457_vm11, %v444_v27, %v447_v34  ;;  %v466_v53 = vsel %vm460_vm12, %v453_v40, 920167782 }
  0xba   : > { %v469_v29 = vsel %vm457_vm11, %v447_v34, %v450_v37  ;;  %v367_v32 = vsel %vm365_vm10, %v366_v50, %v362_v36  ;;  %vm458_vm14 = vcmp.lt.s32.totalorder %v1956_v4, 2  ;;  %v467_v31 = vsel %vm459_vm13, %v450_v37, %v466_v53 }
  0xbb   : > { %v470_v33 = vsel %vm460_vm12, %v456_v41, 1326507024  ;;  %v368_v39 = vadd.s32 %v367_v32, %v363_v49  ;;  %v468_v55 = vsel %vm458_vm14, %v465_v52, %v467_v31  ;;  %v590_v58 = vadd.s32 1, %v1657_v48 }
  0xbc   : > { %v471_v56 = vsel %vm459_vm13, %v453_v40, %v470_v33  ;;  %v474_v61 = vand.u32 65535, %v1975_v46  ;;  %v498_v62 = vand.u32 65535, %v468_v55  ;;  %v499_v63 = vshrl.u32 %v468_v55, 16 }
  0xbd   : > { %v472_v59 = vsel %vm458_vm14, %v469_v29, %v471_v56  ;;  %v369_v1 = vadd.s32 536870912, %v368_v39  ;;  %v475_v2 = vshrl.u32 %v1975_v46, 16  ;;  %v441_v16 = vshrl.u32 %v3025_v45, %v440_v8 }
  0xbe   : > { %v476_v38 = vand.u32 65535, %v472_v59  ;;  %v477_v42 = vshrl.u32 %v472_v59, 16  ;;  %v501_v3 = vmul.u32 %v499_v63, %v474_v61  ;;  %v500_v11 = vmul.u32 %v498_v62, %v474_v61 }
  0xbf   : > { %v2001_v5 = vshrl.u32 %v369_v1, 30  ;;  %v502_v9 = vmul.u32 %v498_v62, %v475_v2  ;;  %vm591_vm15 = vcmp.gt.s32.totalorder %v590_v58, 0  ;;  %v462_v21 = vsel %vm460_vm12, %v450_v37, 2102212464 }
  0xc0   : > { %v479_v6 = vmul.u32 %v477_v42, %v474_v61  ;;  %v480_v10 = vmul.u32 %v476_v38, %v475_v2  ;;  %v504_v13 = vshll.u32 %v501_v3, 16  ;;  %v478_v19 = vmul.u32 %v476_v38, %v474_v61 }
  0xc1   : > { %v481_v22 = vmul.u32 %v477_v42, %v475_v2  ;;  %v503_v23 = vmul.u32 %v499_v63, %v475_v2  ;;  %v371_v24 = vshll.u32 %v2001_v5, 30  ;;  %v506_v35 = vshll.u32 %v502_v9, 16 }
  0xc2   : > { %v482_v20 = vshll.u32 %v479_v6, 16  ;;  %vm508_vm0 = vc.u32 %v500_v11, %v504_v13  ;;  %v484_v36 = vshll.u32 %v480_v10, 16  ;;  %v510_v8 = vadd.s32 %v504_v13, %v500_v11 }
  0xc3   : > { %v509_v41 = vsel %vm508_vm0, 1, %v3030_v0  ;;  %v461_v48 = vsel %vm457_vm11, %v441_v16, %v444_v27  ;;  %v592_v50 = vsel %vm591_vm15, %v590_v58, 0  ;;  %v463_v37 = vsel %vm459_vm13, %v447_v34, %v462_v21 }
  0xc4   : > { %vm486_vm1 = vc.u32 %v478_v19, %v482_v20  ;;  %v488_v25 = vadd.s32 %v482_v20, %v478_v19  ;;  %v511_v52 = vadd.s32 %v509_v41, %v503_v23  ;;  %vm512_vm3 = vc.u32 %v510_v8, %v506_v35 }
  0xc5   : > { %v487_v40 = vsel %vm486_vm1, 1, %v3030_v0  ;;  %v2013_v53 = vsub.s32 %v368_v39, %v371_v24  ;;  %v505_v32 = vshrl.u32 %v501_v3, 16  ;;  %v513_v31 = vsel %vm512_vm3, 1, %v3030_v0 }
  0xc6   : > { %v489_v49 = vadd.s32 %v487_v40, %v481_v22  ;;  %vm490_vm2 = vc.u32 %v488_v25, %v484_v36  ;;  %v483_v33 = vshrl.u32 %v479_v6, 16  ;;  %v515_v56 = vadd.s32 %v513_v31, %v511_v52 }
  0xc7   : > { %v491_v29 = vsel %vm490_vm2, 1, %v3030_v0  ;;  %v594_v59 = vand.u32 31, %v592_v50  ;;  %v485_v27 = vshrl.u32 %v480_v10, 16  ;;  %v580_v58 = vand.u32 2147483647, %v1915_v30 }
  0xc8   : > { %v493_v55 = vadd.s32 %v491_v29, %v489_v49  ;;  %v507_v62 = vshrl.u32 %v502_v9, 16  ;;  %v516_v34 = vadd.s32 %v515_v56, %v505_v32  ;;  %v374_v39 = vsub.s32 0, %v2013_v53 }
  0xc9   : > { %v2018_v63 = vsub.s32 32, %v594_v59  ;;  %v464_v1 = vsel %vm458_vm14, %v461_v48, %v463_v37  ;;  %vm373_vm4 = vcmp.lt.s32.totalorder %v2013_v53, 0  ;;  %v2026_v42 = vadd.s32 %v510_v8, %v506_v35 }
  0xca   : > { %v494_v61 = vadd.s32 %v493_v55, %v483_v33  ;;  %v517_v38 = vadd.s32 %v516_v34, %v507_v62  ;;  %v518_v3 = vmul.u32 %v1975_v46, %v464_v1  ;;  %v587_v6 = vand.u32 8388607, %v580_v58 }
  0xcb   : > { %v601_v9 = vshrl.u32 %v3020_v51, %v2018_v63  ;;  %v604_v10 = vshrl.u32 %v3023_v54, %v2018_v63  ;;  %v375_v4 = vsel %vm373_vm4, %v374_v39, %v2013_v53  ;;  %v2038_v13 = vshrl.u32 %v592_v50, 5 }
  0xcc   : > { %v2024_v2 = vadd.s32 %v494_v61, %v485_v27  ;;  %v521_v11 = vadd.s32 1, %v517_v38  ;;  %v600_v16 = vshll.u32 %v3027_v47, %v594_v59  ;;  %v603_v46 = vshll.u32 %v3020_v51, %v594_v59 }
  0xcd   : > { %v606_v19 = vshll.u32 %v3023_v54, %v594_v59  ;;  %v607_v20 = vshrl.u32 %v3018_v57, %v2018_v63  ;;  %v598_v22 = vshrl.u32 %v3027_v47, %v2018_v63  ;;  %v609_v23 = vshll.u32 %v3018_v57, %v594_v59 }
  0xce   : > { %vm520_vm5 = vc.u32 %v2024_v2, %v2026_v42  ;;  %v610_v24 = vshrl.u32 %v3016_v60, %v2018_v63  ;;  %v2050_v35 = vor.u32 %v601_v9, %v600_v16  ;;  %v2052_v36 = vor.u32 %v604_v10, %v603_v46 }
  0xcf   : > { %v522_v21 = vsel %vm520_vm5, %v521_v11, %v517_v38  ;;  %v608_v40 = vor.u32 %v607_v20, %v606_v19  ;;  %v376_v41 = vclz %v375_v4  ;;  %v588_v8 = vor.u32 8388608, %v587_v6 }
  0xd0   : > { %v523_v25 = vadd.s32 %v522_v21, %v518_v3  ;;  %v597_v48 = vshll.u32 %v3025_v45, %v594_v59  ;;  %v611_v49 = vor.u32 %v610_v24, %v609_v23  ;;  %vm612_vm6 = vcmp.lt.s32.totalorder %v2038_v13, 1 }
  0xd1   : > { %vm615_vm7 = vcmp.lt.s32.totalorder %v2038_v13, 4  ;;  %v624_v29 = vsel %vm612_vm6, %v2050_v35, %v2052_v36  ;;  %v1652_v32 = vadd.s32 4294967294, %v376_v41  ;;  %vm614_vm8 = vcmp.lt.s32.totalorder %v2038_v13, 3 }
  0xd2   : > { %v524_v50 = vadd.s32 536870912, %v523_v25  ;;  %v2055_v37 = vor.u32 %v598_v22, %v597_v48  ;;  %v621_v52 = vsel %vm615_vm7, %v608_v40, 920167782  ;;  %v625_v31 = vsel %vm615_vm7, %v611_v49, 1326507024 }
  0xd3   : > { %v2068_v33 = vshll.u32 %v588_v8, 8  ;;  %vm613_vm9 = vcmp.lt.s32.totalorder %v2038_v13, 2  ;;  %v626_v56 = vsel %vm614_vm8, %v608_v40, %v625_v31  ;;  %v622_v27 = vsel %vm614_vm8, %v2052_v36, %v621_v52 }
  0xd4   : > { %v2070_v55 = vshrl.u32 %v524_v50, 30  ;;  %v620_v59 = vsel %vm612_vm6, %v2055_v37, %v2050_v35  ;;  %v627_v61 = vsel %vm613_vm9, %v624_v29, %v626_v56  ;;  %vm1653_vm10 = vcmp.lt.s32.totalorder %v1652_v32, 0 }
  0xd5   : > { %v631_v62 = vand.u32 65535, %v627_v61  ;;  %v629_v34 = vand.u32 65535, %v2068_v33  ;;  %v632_v39 = vshrl.u32 %v627_v61, 16  ;;  %v623_v38 = vsel %vm613_vm9, %v620_v59, %v622_v27 }
  0xd6   : > { %v526_v1 = vshll.u32 %v2070_v55, 30  ;;  %v630_v3 = vshrl.u32 %v2068_v33, 16  ;;  %v379_v9 = vsel %vm1653_vm10, 0, %v1652_v32  ;;  %v654_v16 = vshrl.u32 %v623_v38, 16 }
  0xd7   : > { %v634_v6 = vmul.u32 %v632_v39, %v629_v34  ;;  %v633_v4 = vmul.u32 %v631_v62, %v629_v34  ;;  %v384_v19 = vsub.s32 4294967266, %v379_v9  ;;  %v653_v24 = vand.u32 65535, %v623_v38 }
  0xd8   : > { %v635_v10 = vmul.u32 %v631_v62, %v630_v3  ;;  %v2089_v46 = vsub.s32 %v523_v25, %v526_v1  ;;  %v636_v20 = vmul.u32 %v632_v39, %v630_v3  ;;  %v656_v40 = vmul.u32 %v654_v16, %v629_v34 }
  0xd9   : > { %v637_v11 = vshll.u32 %v634_v6, 16  ;;  %v228_v41 = vperm.slane %v1903_v17, 0  ;;  %v385_v49 = vadd.s32 127, %v384_v19  ;;  %v380_v50 = vsub.s32 32, %v379_v9 }
  0xda   : > { %v639_v21 = vshll.u32 %v635_v10, 16  ;;  %v529_v8 = vsub.s32 0, %v2089_v46  ;;  %vm528_vm13 = vcmp.lt.s32.totalorder %v2089_v46, 0  ;;  %v655_v52 = vmul.u32 %v653_v24, %v629_v34 }
  0xdb   : > { %vm641_vm11 = vc.u32 %v633_v4, %v637_v11  ;;  %v643_v23 = vadd.s32 %v637_v11, %v633_v4  ;;  %v657_v29 = vmul.u32 %v653_v24, %v630_v3  ;;  %v659_v32 = vshll.u32 %v656_v40, 16 }
  0xdc   : > { %v642_v22 = vsel %vm641_vm11, 1, %v3030_v0  ;;  %v256_v31 = vmul.f32 %v228_v41, %v1892_v12  ;;  %v364_v56 = vadd.s32 %v1959_v7, %v1970_v26  ;;  %v530_v17 = vsel %vm528_vm13, %v529_v8, %v2089_v46 }
  0xdd   : > { %v644_v48 = vadd.s32 %v642_v22, %v636_v20  ;;  %vm645_vm12 = vc.u32 %v643_v23, %v639_v21  ;;  %v386_v27 = vshll.u32 %v385_v49, 23  ;;  %v658_v61 = vmul.u32 %v654_v16, %v630_v3  ;;  %v232_v16 = vpop.permute.xlu2 %231 }
  0xde   : > { %v646_v25 = vsel %vm645_vm12, 1, %v3030_v0  ;;  %vm663_vm14 = vc.u32 %v655_v52, %v659_v32  ;;  %v382_v62 = vshrl.u32 %v364_v56, %v380_v50  ;;  %v638_v39 = vshrl.u32 %v634_v6, 16 }
  0xdf   : > { %v648_v59 = vadd.s32 %v646_v25, %v644_v48  ;;  %v664_v1 = vsel %vm663_vm14, 1, %v3030_v0  ;;  %v531_v38 = vclz %v530_v17  ;;  %v661_v4 = vshll.u32 %v657_v29, 16 }
  0xe0   : > { %v665_v34 = vadd.s32 %v659_v32, %v655_v52  ;;  %v666_v11 = vadd.s32 %v664_v1, %v658_v61  ;;  %v2102_v19 = vadd.f32 %v1898_v14, %v256_v31  ;;  %v381_v7 = vshll.u32 %v2013_v53, %v379_v9 }
  0xe1   : > { %v649_v20 = vadd.s32 %v648_v59, %v638_v39  ;;  %v387_v26 = vor.u32 4788187, %v386_v27  ;;  %v617_v3 = vsel %vm615_vm7, %v2052_v36, 2102212464  ;;  %v596_v6 = vshrl.u32 %v3025_v45, %v2018_v63 }
  0xe2   : > { %vm667_vm15 = vc.u32 %v665_v34, %v661_v4  ;;  %v640_v21 = vshrl.u32 %v635_v10, 16  ;;  %v383_v23 = vor.u32 %v382_v62, %v381_v7  ;;  %v1655_v24 = vadd.s32 4294967294, %v531_v38 }
  0xe3   : > { %v668_v22 = vsel %vm667_vm15, 1, %v3030_v0  ;;  %v660_v41 = vshrl.u32 %v656_v40, 16  ;;  %v616_v53 = vsel %vm612_vm6, %v596_v6, %v2055_v37  ;;  %v618_v36 = vsel %vm614_vm8, %v2050_v35, %v617_v3 }
  0xe4   : > { %v670_v8 = vadd.s32 %v668_v22, %v666_v11  ;;  %v2117_v9 = vadd.s32 %v649_v20, %v640_v21  ;;  %v738_v48 = vand.u32 2139095040, %v2102_v19  ;;  %v388_v63 = vand.u32 2147483647, %v387_v26 }
  0xe5   : > { %v662_v10 = vshrl.u32 %v657_v29, 16  ;;  %v234_v25 = vperm.slane %v232_v16, 0  ;;  %v2120_v50 = vadd.s32 %v665_v34, %v661_v4  ;;  %v390_v52 = vcvt.s32.f32 %v383_v23  ;;  %v238_v62 = vpop.permute.xlu2 %237 }
  0xe6   : > { %v671_v49 = vadd.s32 %v670_v8, %v660_v41  ;;  %v739_v40 = vshrl.u32 %v738_v48, 23  ;;  %vm1656_vm0 = vcmp.lt.s32.totalorder %v1655_v24, 0  ;;  %v619_v37 = vsel %vm613_vm9, %v616_v53, %v618_v36 }
  0xe7   : > { %vm675_vm1 = vc.u32 %v2117_v9, %v2120_v50  ;;  %v391_v31 = vmul.f32 %v390_v52, %v388_v63  ;;  %v2126_v17 = vsel %vm1656_vm0, 0, %v1655_v24  ;;  %v673_v29 = vmul.u32 %v2068_v33, %v619_v37 }
  0xe8   : > { %v672_v32 = vadd.s32 %v671_v49, %v662_v10  ;;  %v1660_v35 = vadd.s32 4294967169, %v739_v40  ;;  %v257_v27 = vmul.f32 %v234_v25, %v1892_v12  ;;  %v539_v1 = vsub.s32 4294967266, %v2126_v17 }
  0xe9   : > { %v392_v13 = vxor.u32 2147483648, %v391_v31  ;;  %v735_v38 = vand.u32 2147483647, %v2102_v19  ;;  %v240_v20 = vperm.slane %v238_v62, 0  ;;  %vm272_vm3 = vcmp.lt.s32.totalorder %v1901_v15, 0 }
  0xea   : > { %v676_v56 = vadd.s32 1, %v672_v32  ;;  %v745_v59 = vadd.s32 1, %v1660_v35  ;;  %v2133_v7 = vadd.f32 %v1898_v14, %v257_v27  ;;  %v540_v16 = vadd.s32 127, %v539_v1 }
  0xeb   : > { %v393_v3 = vsel %vm272_vm3, %v392_v13, %v391_v31  ;;  %v742_v6 = vand.u32 8388607, %v735_v38  ;;  %v258_v22 = vmul.f32 %v240_v20, %v1892_v12  ;;  %vm2148_vm4 = vcmp.le.f32.partialorder %v270_v18, 0.7853982 }
  0xec   : > { %v677_v61 = vsel %vm675_vm1, %v676_v56, %v672_v32  ;;  %vm746_vm2 = vcmp.gt.s32.totalorder %v745_v59, 0  ;;  %v519_v24 = vadd.s32 %v2026_v42, %v2024_v2  ;;  %v893_v41 = vand.u32 2139095040, %v2133_v7 }
  0xed   : > { %v678_v39 = vadd.s32 %v677_v61, %v673_v29  ;;  %v747_v4 = vsel %vm746_vm2, %v745_v59, 0  ;;  %v2158_v8 = vsel %vm2148_vm4, %v1901_v15, %v393_v3  ;;  %v535_v36 = vsub.s32 32, %v2126_v17 }
  0xee   : > { %v749_v11 = vand.u32 31, %v747_v4  ;;  %v541_v48 = vshll.u32 %v540_v16, 23  ;;  %v743_v63 = vor.u32 8388608, %v742_v6  ;;  %v2175_v40 = vshrl.u32 %v747_v4, 5 }
  0xef   : > { %v679_v34 = vadd.s32 536870912, %v678_v39  ;;  %v894_v37 = vshrl.u32 %v893_v41, 23  ;;  %v2184_v29 = vadd.f32 %v1898_v14, %v258_v22  ;;  %v537_v59 = vshrl.u32 %v519_v24, %v535_v36 }
  0xf0   : > { %v2138_v26 = vsub.s32 32, %v749_v11  ;;  %v752_v10 = vshll.u32 %v3025_v45, %v749_v11  ;;  %v755_v49 = vshll.u32 %v3027_v47, %v749_v11  ;;  %v761_v52 = vshll.u32 %v3023_v54, %v749_v11 }
  0xf1   : > { %v2136_v33 = vshrl.u32 %v679_v34, 30  ;;  %v758_v31 = vshll.u32 %v3020_v51, %v749_v11  ;;  %v2188_v61 = vmul.f32 %v2158_v8, %v2158_v8  ;;  %v764_v13 = vshll.u32 %v3018_v57, %v749_v11 }
  0xf2   : > { %v753_v12 = vshrl.u32 %v3027_v47, %v2138_v26  ;;  %v756_v18 = vshrl.u32 %v3020_v51, %v2138_v26  ;;  %v762_v2 = vshrl.u32 %v3018_v57, %v2138_v26  ;;  %v759_v25 = vshrl.u32 %v3023_v54, %v2138_v26 }
  0xf3   : > { %v681_v21 = vshll.u32 %v2136_v33, 30  ;;  %v765_v56 = vshrl.u32 %v3016_v60, %v2138_v26  ;;  %v536_v1 = vshll.u32 %v2089_v46, %v2126_v17  ;;  %v542_v4 = vor.u32 4788187, %v541_v48 }
  0xf4   : > { %v754_v32 = vor.u32 %v753_v12, %v752_v10  ;;  %v2178_v35 = vor.u32 %v756_v18, %v755_v49  ;;  %v763_v27 = vor.u32 %v762_v2, %v761_v52  ;;  %vm767_vm6 = vcmp.lt.s32.totalorder %v2175_v40, 1 }
  0xf5   : > { %v2160_v53 = vsub.s32 %v678_v39, %v681_v21  ;;  %v760_v39 = vor.u32 %v759_v25, %v758_v31  ;;  %v2195_v34 = vshll.u32 %v743_v63, 8  ;;  %v766_v14 = vor.u32 %v765_v56, %v764_v13 }
  0xf6   : > { %vm770_vm7 = vcmp.lt.s32.totalorder %v2175_v40, 4  ;;  %v775_v20 = vsel %vm767_vm6, %v754_v32, %v2178_v35  ;;  %v1663_v3 = vadd.s32 4294967169, %v894_v37  ;;  %v538_v16 = vor.u32 %v537_v59, %v536_v1 }
  0xf7   : > { %v684_v42 = vsub.s32 0, %v2160_v53  ;;  %vm683_vm5 = vcmp.lt.s32.totalorder %v2160_v53, 0  ;;  %vm769_vm8 = vcmp.lt.s32.totalorder %v2175_v40, 3  ;;  %v776_v46 = vsel %vm770_vm7, %v763_v27, 920167782 }
  0xf8   : > { %v394_v17 = vsub.s32 4, %v2001_v5  ;;  %v406_v11 = vmul.f32 -0.00019511016, %v2188_v61  ;;  %vm768_vm9 = vcmp.lt.s32.totalorder %v2175_v40, 2  ;;  %v777_v21 = vsel %vm769_vm8, %v760_v39, %v776_v46 }
  0xf9   : > { %v685_v62 = vsel %vm683_vm5, %v684_v42, %v2160_v53  ;;  %v543_v22 = vand.u32 2147483647, %v542_v4  ;;  %v778_v24 = vsel %vm768_vm9, %v775_v20, %v777_v21  ;;  %v779_v41 = vsel %vm767_vm6, %v2178_v35, %v760_v39 }
  0xfa   : > { %v686_v6 = vclz %v685_v62  ;;  %v784_v12 = vand.u32 65535, %v2195_v34  ;;  %v780_v18 = vsel %vm770_vm7, %v766_v14, 1326507024  ;;  %v808_v36 = vand.u32 65535, %v778_v24 }
  0xfb   : > { %v809_v48 = vshrl.u32 %v778_v24, 16  ;;  %v900_v63 = vadd.s32 1, %v1663_v3  ;;  %v2218_v2 = vmul.f32 -0.001358992, %v2188_v61  ;;  %v545_v42 = vcvt.s32.f32 %v538_v16 }
  0xfc   : > { %v1658_v10 = vadd.s32 4294967294, %v686_v6  ;;  %v781_v49 = vsel %vm769_vm8, %v763_v27, %v780_v18  ;;  %v2222_v25 = vadd.f32 0.008332121, %v406_v11  ;;  %v785_v37 = vshrl.u32 %v2195_v34, 16 }
  0xfd   : > { %v782_v52 = vsel %vm768_vm9, %v779_v41, %v781_v49  ;;  %v811_v31 = vmul.u32 %v809_v48, %v784_v12  ;;  %v2227_v56 = vmul.f32 %v545_v42, %v543_v22  ;;  %v751_v59 = vshrl.u32 %v3025_v45, %v2138_v26 }
  0xfe   : > { %v786_v62 = vand.u32 65535, %v782_v52  ;;  %v787_v13 = vshrl.u32 %v782_v52, 16  ;;  %v810_v1 = vmul.u32 %v808_v36, %v784_v12  ;;  %v812_v4 = vmul.u32 %v808_v36, %v785_v37 }
  0xff   : > { %v814_v14 = vshll.u32 %v811_v31, 16  ;;  %vm901_vm10 = vcmp.gt.s32.totalorder %v900_v63, 0  ;;  %vm1659_vm11 = vcmp.lt.s32.totalorder %v1658_v10, 0  ;;  %v771_v27 = vsel %vm767_vm6, %v751_v59, %v754_v32 }
 0x100   : > { %v789_v20 = vmul.u32 %v787_v13, %v784_v12  ;;  %v3015_v3 = vand.u32 2147483647, %v2133_v7  ;;  %v772_v16 = vsel %vm770_vm7, %v760_v39, 2102212464  ;;  %v790_v6 = vmul.u32 %v786_v62, %v785_v37 }
 0x101   : > { %v813_v46 = vmul.u32 %v809_v48, %v785_v37  ;;  %vm818_vm12 = vc.u32 %v810_v1, %v814_v14  ;;  %v788_v26 = vmul.u32 %v786_v62, %v784_v12  ;;  %v902_v22 = vsel %vm901_vm10, %v900_v63, 0 }
 0x102   : > { %v792_v11 = vshll.u32 %v789_v20, 16  ;;  %v819_v21 = vsel %vm818_vm12, 1, %v3030_v0  ;;  %v2237_v24 = vsel %vm1659_vm11, 0, %v1658_v10  ;;  %v816_v41 = vshll.u32 %v812_v4, 16 }
 0x103   : > { %v820_v18 = vadd.s32 %v814_v14, %v810_v1  ;;  %v821_v36 = vadd.s32 %v819_v21, %v813_v46  ;;  %v791_v32 = vmul.u32 %v787_v13, %v785_v37  ;;  %v794_v42 = vshll.u32 %v790_v6, 16 }
 0x104   : > { %vm796_vm13 = vc.u32 %v788_v26, %v792_v11  ;;  %v798_v49 = vadd.s32 %v792_v11, %v788_v26  ;;  %v773_v39 = vsel %vm769_vm8, %v2178_v35, %v772_v16  ;;  %v904_v12 = vand.u32 31, %v902_v22 }
 0x105   : > { %v797_v48 = vsel %vm796_vm13, 1, %v3030_v0  ;;  %vm822_vm14 = vc.u32 %v820_v18, %v816_v41  ;;  %v694_v52 = vsub.s32 4294967266, %v2237_v24  ;;  %v815_v37 = vshrl.u32 %v811_v31, 16 }
 0x106   : > { %v799_v63 = vadd.s32 %v797_v48, %v791_v32  ;;  %vm800_vm15 = vc.u32 %v798_v49, %v794_v42  ;;  %v823_v10 = vsel %vm822_vm14, 1, %v3030_v0  ;;  %v2246_v13 = vsub.s32 32, %v904_v12 }
 0x107   : > { %v801_v59 = vsel %vm800_vm15, 1, %v3030_v0  ;;  %v825_v62 = vadd.s32 %v823_v10, %v821_v36  ;;  %v547_v1 = vxor.u32 2147483648, %v2227_v56  ;;  %v674_v35 = vadd.s32 %v2120_v50, %v2117_v9 }
 0x108   : > { %v793_v14 = vshrl.u32 %v789_v20, 16  ;;  %v803_v16 = vadd.s32 %v801_v59, %v799_v63  ;;  %v774_v46 = vsel %vm768_vm9, %v771_v27, %v773_v39  ;;  %v817_v26 = vshrl.u32 %v812_v4, 16 }
 0x109   : > { %v826_v11 = vadd.s32 %v825_v62, %v815_v37  ;;  %v897_v21 = vand.u32 8388607, %v3015_v3  ;;  %v695_v32 = vadd.s32 127, %v694_v52  ;;  %v795_v31 = vshrl.u32 %v790_v6, 16 }
 0x10a   : > { %v804_v36 = vadd.s32 %v803_v16, %v793_v14  ;;  %v2255_v42 = vadd.s32 %v820_v18, %v816_v41  ;;  %v910_v48 = vshll.u32 %v3027_v47, %v904_v12  ;;  %v916_v9 = vshll.u32 %v3023_v54, %v904_v12 }
 0x10b   : > { %v827_v49 = vadd.s32 %v826_v11, %v817_v26  ;;  %v917_v50 = vshrl.u32 %v3018_v57, %v2246_v13  ;;  %vm427_vm0 = vcmp.lt.s32.totalorder %v1912_v28, 0  ;;  %v911_v4 = vshrl.u32 %v3020_v51, %v2246_v13 }
 0x10c   : > { %v2262_v40 = vadd.s32 %v804_v36, %v795_v31  ;;  %v913_v27 = vshll.u32 %v3020_v51, %v904_v12  ;;  %v914_v20 = vshrl.u32 %v3023_v54, %v2246_v13  ;;  %v690_v6 = vsub.s32 32, %v2237_v24 }
 0x10d   : > { %v831_v41 = vadd.s32 1, %v827_v49  ;;  %v2270_v18 = vshrl.u32 %v902_v22, 5  ;;  %v919_v39 = vshll.u32 %v3018_v57, %v904_v12  ;;  %v828_v52 = vmul.u32 %v2195_v34, %v774_v46 }
 0x10e   : > { %vm830_vm1 = vc.u32 %v2262_v40, %v2255_v42  ;;  %v907_v63 = vshll.u32 %v3025_v45, %v904_v12  ;;  %v908_v10 = vshrl.u32 %v3027_v47, %v2246_v13  ;;  %vm2281_vm2 = vcmp.le.f32.partialorder %v425_v43, 0.7853982 }
 0x10f   : > { %v696_v22 = vshll.u32 %v695_v32, 23  ;;  %v832_v37 = vsel %vm830_vm1, %v831_v41, %v827_v49  ;;  %v918_v62 = vor.u32 %v917_v50, %v916_v9  ;;  %v920_v34 = vshrl.u32 %v3016_v60, %v2246_v13  ;;  %v244_v50 = vpop.permute.xlu0 %243 }
 0x110   : > { %v833_v14 = vadd.s32 %v832_v37, %v828_v52  ;;  %v898_v16 = vor.u32 8388608, %v897_v21  ;;  %v2287_v46 = vor.u32 %v911_v4, %v910_v48  ;;  %v2289_v12 = vor.u32 %v914_v20, %v913_v27 }
 0x111   : > { %v692_v26 = vshrl.u32 %v674_v35, %v690_v6  ;;  %v921_v11 = vor.u32 %v920_v34, %v919_v39  ;;  %vm922_vm5 = vcmp.lt.s32.totalorder %v2270_v18, 1  ;;  %vm925_vm6 = vcmp.lt.s32.totalorder %v2270_v18, 4 }
 0x112   : > { %v408_v43 = vmul.f32 %v2222_v25, %v2188_v61  ;;  %v834_v32 = vadd.s32 536870912, %v833_v14  ;;  %v2295_v31 = vor.u32 %v908_v10, %v907_v63  ;;  %vm924_vm7 = vcmp.lt.s32.totalorder %v2270_v18, 3 }
 0x113   : > { %v691_v21 = vshll.u32 %v2160_v53, %v2237_v24  ;;  %v697_v36 = vor.u32 4788187, %v696_v22  ;;  %v931_v35 = vsel %vm925_vm6, %v918_v62, 920167782  ;;  %v935_v49 = vsel %vm925_vm6, %v921_v11, 1326507024 }
 0x114   : > { %v400_v48 = vadd.f32 0.041655596, %v2218_v2  ;;  %v2305_v9 = vshrl.u32 %v834_v32, 30  ;;  %vm923_vm8 = vcmp.lt.s32.totalorder %v2270_v18, 2  ;;  %v934_v25 = vsel %vm922_vm5, %v2287_v46, %v2289_v12 }
 0x115   : > { %v548_v53 = vsel %vm427_vm0, %v547_v1, %v2227_v56  ;;  %v693_v24 = vor.u32 %v692_v26, %v691_v21  ;;  %v936_v4 = vsel %vm924_vm7, %v918_v62, %v935_v49  ;;  %v2317_v27 = vshll.u32 %v898_v16, 8 }
 0x116   : > { %v409_v2 = vadd.f32 -0.16666654, %v408_v43  ;;  %v836_v20 = vshll.u32 %v2305_v9, 30  ;;  %v930_v6 = vsel %vm922_vm5, %v2295_v31, %v2287_v46  ;;  %v932_v41 = vsel %vm924_vm7, %v2289_v12, %v931_v35 }
 0x117   : > { %v698_v39 = vand.u32 2147483647, %v697_v36  ;;  %v937_v56 = vsel %vm923_vm8, %v934_v25, %v936_v4  ;;  %v939_v1 = vand.u32 65535, %v2317_v27  ;;  %v940_v52 = vshrl.u32 %v2317_v27, 16  ;;  %v1734_v36 = vld [vmem:[%s3012_s2] sm:$0x1] }
 0x118   : > { %v246_v63 = vperm.slane %v244_v50, 0  ;;  %v2336_v10 = vsel %vm272_vm3, %v394_v17, %v2001_v5  ;;  %v2341_v22 = vsel %vm2281_vm2, %v1912_v28, %v548_v53  ;;  %v2343_v37 = vsub.s32 %v833_v14, %v836_v20 }
 0x119   : > { %v700_v62 = vcvt.s32.f32 %v693_v24  ;;  %v933_v34 = vsel %vm923_vm8, %v930_v6, %v932_v41  ;;  %v941_v16 = vand.u32 65535, %v937_v56  ;;  %v942_v26 = vshrl.u32 %v937_v56, 16 }
 0x11a   : > { %v401_v11 = vmul.f32 %v400_v48, %v2188_v61  ;;  %v410_v43 = vmul.f32 %v409_v2, %v2188_v61  ;;  %vm582_vm3 = vcmp.lt.s32.totalorder %v1915_v30, 0  ;;  %vm838_vm9 = vcmp.lt.s32.totalorder %v2343_v37, 0 }
 0x11b   : > { %v839_v5 = vsub.s32 0, %v2343_v37  ;;  %v2354_v17 = vmul.f32 %v2341_v22, %v2341_v22  ;;  %v701_v14 = vmul.f32 %v700_v62, %v698_v39  ;;  %v944_v32 = vmul.u32 %v942_v26, %v939_v1 }
 0x11c   : > { %v945_v21 = vmul.u32 %v941_v16, %v940_v52  ;;  %v2359_v35 = vmul.f32 %v1734_v36, %v246_v63  ;;  %v943_v48 = vmul.u32 %v941_v16, %v939_v1  ;;  %v964_v25 = vshrl.u32 %v933_v34, 16 }
 0x11d   : > { %v840_v49 = vsel %vm838_vm9, %v839_v5, %v2343_v37  ;;  %v397_v50 = vsel %vm2148_vm4, 0, %v2336_v10  ;;  %v947_v24 = vshll.u32 %v944_v32, 16  ;;  %v963_v4 = vand.u32 65535, %v933_v34 }
 0x11e   : > { %v841_v53 = vclz %v840_v49  ;;  %v402_v2 = vadd.f32 -0.4999988, %v401_v11  ;;  %v549_v20 = vsub.s32 4, %v2070_v55  ;;  %v946_v6 = vmul.u32 %v942_v26, %v940_v52 }
 0x11f   : > { %v949_v41 = vshll.u32 %v945_v21, 16  ;;  %v411_v39 = vadd.f32 1.0, %v410_v43  ;;  %v561_v56 = vmul.f32 -0.00019511016, %v2354_v17  ;;  %v702_v63 = vxor.u32 2147483648, %v701_v14 }
 0x120   : > { %v1661_v62 = vadd.s32 4294967294, %v841_v53  ;;  %vm2369_vm10 = vcmp.le.f32.partialorder %v580_v58, 0.7853982  ;;  %v948_v23 = vshrl.u32 %v944_v32, 16  ;;  %vm951_vm4 = vc.u32 %v943_v48, %v947_v24 }
 0x121   : > { %v953_v10 = vadd.s32 %v947_v24, %v943_v48  ;;  %v966_v34 = vmul.u32 %v964_v25, %v939_v1  ;;  %v952_v11 = vsel %vm951_vm4, 1, %v3030_v0  ;;  %v965_v26 = vmul.u32 %v963_v4, %v939_v1 }
 0x122   : > { %vm1662_vm11 = vcmp.lt.s32.totalorder %v1661_v62, 0  ;;  %v967_v5 = vmul.u32 %v963_v4, %v940_v52  ;;  %v954_v36 = vadd.s32 %v952_v11, %v946_v6  ;;  %v703_v53 = vsel %vm582_vm3, %v702_v63, %v701_v14 }
 0x123   : > { %v844_v43 = vsel %vm1662_vm11, 0, %v1661_v62  ;;  %vm955_vm12 = vc.u32 %v953_v10, %v949_v41  ;;  %v969_v49 = vshll.u32 %v966_v34, 16  ;;  %v968_v60 = vmul.u32 %v964_v25, %v940_v52 }
 0x124   : > { %v849_v58 = vsub.s32 4294967266, %v844_v43  ;;  %v956_v3 = vsel %vm955_vm12, 1, %v3030_v0  ;;  %v845_v32 = vsub.s32 32, %v844_v43  ;;  %v906_v48 = vshrl.u32 %v3025_v45, %v2246_v13 }
 0x125   : > { %v958_v24 = vadd.s32 %v956_v3, %v954_v36  ;;  %v971_v57 = vshll.u32 %v967_v5, 16  ;;  %v927_v1 = vsel %vm925_vm6, %v2289_v12, 2102212464  ;;  %vm973_vm13 = vc.u32 %v965_v26, %v969_v49 }
 0x126   : > { %v850_v51 = vadd.s32 127, %v849_v58  ;;  %v975_v4 = vadd.s32 %v969_v49, %v965_v26  ;;  %v829_v14 = vadd.s32 %v2255_v42, %v2262_v40  ;;  %v950_v6 = vshrl.u32 %v945_v21, 16 }
 0x127   : > { %v959_v41 = vadd.s32 %v958_v24, %v948_v23  ;;  %v974_v52 = vsel %vm973_vm13, 1, %v3030_v0  ;;  %v970_v63 = vshrl.u32 %v966_v34, 16  ;;  %v926_v13 = vsel %vm922_vm5, %v906_v48, %v2295_v31  ;;  %v1735_v24 = vld [vmem:[%s3013_s3] sm:$0x1] }
 0x128   : > { %v851_v25 = vshll.u32 %v850_v51, 23  ;;  %v976_v62 = vadd.s32 %v974_v52, %v968_v60  ;;  %vm977_vm14 = vc.u32 %v975_v4, %v971_v57  ;;  %v847_v3 = vshrl.u32 %v829_v14, %v845_v32 }
 0x129   : > { %v928_v12 = vsel %vm924_vm7, %v2287_v46, %v927_v1  ;;  %v978_v10 = vsel %vm977_vm14, 1, %v3030_v0  ;;  %v2395_v42 = vsel %vm2369_vm10, %v1915_v30, %v703_v53  ;;  %v846_v51 = vshll.u32 %v2343_v37, %v844_v43 }
 0x12a   : > { %v972_v60 = vshrl.u32 %v967_v5, 16  ;;  %v980_v40 = vadd.s32 %v978_v10, %v976_v62  ;;  %v852_v21 = vor.u32 4788187, %v851_v25  ;;  %v2398_v23 = vadd.s32 %v959_v41, %v950_v6 }
 0x12b   : > { %v2400_v34 = vadd.s32 %v975_v4, %v971_v57  ;;  %v1048_v31 = vand.u32 2139095040, %v2184_v29  ;;  %v403_v46 = vmul.f32 %v402_v2, %v2188_v61  ;;  %v414_v11 = vadd.s32 3, %v397_v50 }
 0x12c   : > { %v929_v26 = vsel %vm923_vm8, %v926_v13, %v928_v12  ;;  %v981_v36 = vadd.s32 %v980_v40, %v970_v63  ;;  %v412_v49 = vmul.f32 %v411_v39, %v2158_v8  ;;  %v550_v37 = vsel %vm427_vm0, %v549_v20, %v2070_v55 }
 0x12d   : > { %v848_v5 = vor.u32 %v847_v3, %v846_v51  ;;  %v1049_v43 = vshrl.u32 %v1048_v31, 23  ;;  %v554_v57 = vmul.f32 -0.001358992, %v2354_v17  ;;  %v562_v53 = vadd.f32 0.008332121, %v561_v56 }
 0x12e   : > { %v2413_v58 = vmul.f32 %v2395_v42, %v2395_v42  ;;  %v982_v61 = vadd.s32 %v981_v36, %v972_v60  ;;  %v853_v50 = vand.u32 2147483647, %v852_v21  ;;  %v983_v18 = vmul.u32 %v2317_v27, %v929_v26 }
 0x12f   : > { %vm985_vm15 = vc.u32 %v2398_v23, %v2400_v34  ;;  %v1666_v8 = vadd.s32 4294967169, %v1049_v43  ;;  %v404_v2 = vadd.f32 1.0, %v403_v46  ;;  %v415_v39 = vand.u32 3, %v414_v11 }
 0x130   : > { %v986_v55 = vadd.s32 1, %v982_v61  ;;  %v418_v20 = vxor.u32 2147483648, %v412_v49  ;;  %v552_v32 = vsel %vm2281_vm2, 0, %v550_v37  ;;  %v855_v56 = vcvt.s32.f32 %v848_v5 }
 0x131   : > { %v1055_v48 = vadd.s32 1, %v1666_v8  ;;  %v2424_v1 = vadd.f32 %v1735_v24, %v2359_v35  ;;  %v555_v27 = vadd.f32 0.041655596, %v554_v57  ;;  %v563_v4 = vmul.f32 %v562_v53, %v2354_v17 }
 0x132   : > { %v987_v14 = vsel %vm985_vm15, %v986_v55, %v982_v61  ;;  %v716_v6 = vmul.f32 -0.00019511016, %v2413_v58  ;;  %v856_v41 = vmul.f32 %v855_v56, %v853_v50  ;;  %vm417_vm1 = vcmp.eq.s32.totalorder %v415_v39, 0 }
 0x133   : > { %v988_v52 = vadd.s32 %v987_v14, %v983_v18  ;;  %vm1056_vm0 = vcmp.gt.s32.totalorder %v1055_v48, 0  ;;  %v421_v59 = vxor.u32 2147483648, %v404_v2  ;;  %v569_v25 = vadd.s32 3, %v552_v32 }
 0x134   : > { %v1057_v63 = vsel %vm1056_vm0, %v1055_v48, 0  ;;  %v419_v62 = vsel %vm417_vm1, %v404_v2, %v418_v20  ;;  %vm420_vm2 = vcmp.eq.s32.totalorder %v415_v39, 2  ;;  %v556_v35 = vmul.f32 %v555_v27, %v2354_v17 }
 0x135   : > { %v989_v3 = vadd.s32 536870912, %v988_v52  ;;  %v1059_v13 = vand.u32 31, %v1057_v63  ;;  %v564_v12 = vadd.f32 -0.16666654, %v563_v4  ;;  %v704_v10 = vsub.s32 4, %v2136_v33 }
 0x136   : > { %v709_v51 = vmul.f32 -0.001358992, %v2413_v58  ;;  %v717_v60 = vadd.f32 0.008332121, %v716_v6  ;;  %v857_v40 = vxor.u32 2147483648, %v856_v41  ;;  %vm416_vm5 = vcmp.lt.s32.totalorder %v415_v39, 2 }
 0x137   : > { %v2431_v21 = vshrl.u32 %v989_v3, 30  ;;  %v3022_v31 = vand.u32 2147483647, %v2184_v29  ;;  %v422_v46 = vsel %vm420_vm2, %v421_v59, %v412_v49  ;;  %v2434_v11 = vand.u32 3, %v569_v25 }
 0x138   : > { %v2436_v26 = vsub.s32 32, %v1059_v13  ;;  %v2438_v36 = vsel %vm416_vm5, %v419_v62, %v422_v46  ;;  %vm2442_vm6 = vcmp.le.f32.partialorder %v735_v38, 0.7853982  ;;  %vm737_vm7 = vcmp.lt.s32.totalorder %v2102_v19, 0 }
 0x139   : > { %3050 = vst [vmem:[#allocation8_spill] sm:$0xff] %v2438_v36  ;;  %v991_v5 = vshll.u32 %v2431_v21, 30  ;;  %v557_v43 = vadd.f32 -0.4999988, %v556_v35  ;;  %v565_v57 = vmul.f32 %v564_v12, %v2354_v17  ;;  %v2452_v49 = vsel %vm582_vm3, %v704_v10, %v2136_v33 }
 0x13a   : > { %v710_v53 = vadd.f32 0.041655596, %v709_v51  ;;  %v718_v61 = vmul.f32 %v717_v60, %v2413_v58  ;;  %v858_v38 = vsel %vm737_vm7, %v857_v40, %v856_v41  ;;  %v1052_v18 = vand.u32 8388607, %v3022_v31 }
 0x13b   : > { %v992_v50 = vsub.s32 %v988_v52, %v991_v5  ;;  %v1062_v8 = vshll.u32 %v3025_v45, %v1059_v13  ;;  %v1063_v2 = vshrl.u32 %v3027_v47, %v2436_v26  ;;  %v1065_v39 = vshll.u32 %v3027_v47, %v1059_v13 }
 0x13c   : > { %v1071_v33 = vshll.u32 %v3023_v54, %v1059_v13  ;;  %v3053_v20 = vmov 2131351028   ;;  %v3054_v56 = vmov 920167782   ;;  %v2468_v24 = vshrl.u32 %v1057_v63, 5 }
 0x13d   : > { %vm993_vm8 = vcmp.lt.s32.totalorder %v992_v50, 0  ;;  %v994_v55 = vsub.s32 0, %v992_v50  ;;  %v1066_v32 = vshrl.u32 %v3053_v20, %v2436_v26  ;;  %v1072_v48 = vshrl.u32 %v3054_v56, %v2436_v26 }
 0x13e   : > { %v1068_v27 = vshll.u32 %v3053_v20, %v1059_v13  ;;  %v1069_v4 = vshrl.u32 %v3023_v54, %v2436_v26  ;;  %v1074_v14 = vshll.u32 %v3054_v56, %v1059_v13  ;;  %v719_v6 = vadd.f32 -0.16666654, %v718_v61 }
 0x13f   : > { %v995_v41 = vsel %vm993_vm8, %v994_v55, %v992_v50  ;;  %v1053_v52 = vor.u32 8388608, %v1052_v18  ;;  %v3055_v59 = vmov 1326507024   ;;  %v2477_v62 = vmul.f32 %v557_v43, %v2354_v17 }
 0x140   : > { %v1075_v25 = vshrl.u32 %v3055_v59, %v2436_v26  ;;  %v2479_v3 = vadd.f32 1.0, %v565_v57  ;;  %v2484_v63 = vsel %vm2442_vm6, %v2102_v19, %v858_v38  ;;  %v996_v35 = vclz %v995_v41 }
 0x141   : > { %3056 = vst [vmem:[#allocation9_spill] sm:$0xff] %v2477_v62  ;;  %v1064_v12 = vor.u32 %v1063_v2, %v1062_v8  ;;  %v2486_v10 = vor.u32 %v1066_v32, %v1065_v39  ;;  %v1073_v13 = vor.u32 %v1072_v48, %v1071_v33  ;;  %v707_v60 = vsel %vm2369_vm10, 0, %v2452_v49 }
 0x142   : > { %3057 = vst [vmem:[#allocation10_spill] sm:$0xff] %v2484_v63  ;;  %v1076_v51 = vor.u32 %v1075_v25, %v1074_v14  ;;  %v1664_v40 = vadd.s32 4294967294, %v996_v35  ;;  %v1070_v17 = vor.u32 %v1069_v4, %v1068_v27  ;;  %vm1077_vm3 = vcmp.lt.s32.totalorder %v2468_v24, 1 }
 0x143   : > { %v2493_v46 = vmul.f32 %v710_v53, %v2413_v58  ;;  %v2496_v5 = vmul.f32 %v719_v6, %v2413_v58  ;;  %vm1080_vm9 = vcmp.lt.s32.totalorder %v2468_v24, 4  ;;  %v2499_v43 = vshll.u32 %v1053_v52, 8 }
 0x144   : > { %v2503_v57 = vmul.f32 %v2484_v63, %v2484_v63  ;;  %vm1665_vm4 = vcmp.lt.s32.totalorder %v1664_v40, 0  ;;  %vm1078_vm11 = vcmp.lt.s32.totalorder %v2468_v24, 2  ;;  %vm1079_vm12 = vcmp.lt.s32.totalorder %v2468_v24, 3 }
 0x145   : > { %v999_v61 = vsel %vm1665_vm4, 0, %v1664_v40  ;;  %v1085_v53 = vsel %vm1077_vm3, %v1064_v12, %v2486_v10  ;;  %v1086_v38 = vsel %vm1080_vm9, %v1073_v13, 920167782  ;;  %v1090_v18 = vsel %vm1080_vm9, %v1076_v51, 1326507024 }
 0x146   : > { %v984_v8 = vadd.s32 %v2400_v34, %v2398_v23  ;;  %v1000_v2 = vsub.s32 32, %v999_v61  ;;  %v1004_v39 = vsub.s32 4294967266, %v999_v61  ;;  %v1089_v33 = vsel %vm1077_vm3, %v2486_v10, %v1070_v17 }
 0x147   : > { %v1087_v55 = vsel %vm1079_vm12, %v1070_v17, %v1086_v38  ;;  %v1091_v32 = vsel %vm1079_vm12, %v1073_v13, %v1090_v18  ;;  %v1094_v48 = vand.u32 65535, %v2499_v43  ;;  %v1095_v27 = vshrl.u32 %v2499_v43, 16 }
 0x148   : > { %v1001_v4 = vshll.u32 %v992_v50, %v999_v61  ;;  %v1002_v14 = vshrl.u32 %v984_v8, %v1000_v2  ;;  %v1005_v6 = vadd.s32 127, %v1004_v39  ;;  %v1088_v23 = vsel %vm1078_vm11, %v1085_v53, %v1087_v55 }
 0x149   : > { %v2528_v34 = vmul.f32 -0.00019511016, %v2503_v57  ;;  %v1092_v41 = vsel %vm1078_vm11, %v1089_v33, %v1091_v32  ;;  %v1118_v52 = vand.u32 65535, %v1088_v23  ;;  %v1119_v25 = vshrl.u32 %v1088_v23, 16 }
 0x14a   : > { %v1003_v35 = vor.u32 %v1002_v14, %v1001_v4  ;;  %v1006_v13 = vshll.u32 %v1005_v6, 23  ;;  %v1096_v51 = vand.u32 65535, %v1092_v41  ;;  %v1097_v40 = vshrl.u32 %v1092_v41, 16 }
 0x14b   : > { %vm892_vm13 = vcmp.lt.s32.totalorder %v2133_v7, 0  ;;  %v1061_v50 = vshrl.u32 %v3025_v45, %v2436_v26  ;;  %v1120_v61 = vmul.u32 %v1118_v52, %v1094_v48  ;;  %v1121_v38 = vmul.u32 %v1119_v25, %v1094_v48 }
 0x14c   : > { %v1122_v53 = vmul.u32 %v1118_v52, %v1095_v27  ;;  %v3058_v18 = vand.u32 2147483647, %v2133_v7  ;;  %v1007_v2 = vor.u32 4788187, %v1006_v13  ;;  %v1098_v39 = vmul.u32 %v1096_v51, %v1094_v48 }
 0x14d   : > { %v1099_v33 = vmul.u32 %v1097_v40, %v1094_v48  ;;  %v3029_v55 = vand.u32 2147483647, %v2424_v1  ;;  %v1014_v32 = vsub.s32 4, %v2431_v21  ;;  %v1100_v4 = vmul.u32 %v1096_v51, %v1095_v27 }
 0x14e   : > { %vm2537_vm14 = vcmp.le.f32.partialorder %v3058_v18, 0.7853982  ;;  %v1123_v14 = vmul.u32 %v1119_v25, %v1095_v27  ;;  %v1124_v6 = vshll.u32 %v1121_v38, 16  ;;  %v1008_v26 = vand.u32 2147483647, %v1007_v2 }
 0x14f   : > { %v1010_v23 = vcvt.s32.f32 %v1003_v35  ;;  %v1101_v41 = vmul.u32 %v1097_v40, %v1095_v27  ;;  %v1102_v52 = vshll.u32 %v1099_v33, 16  ;;  %v1081_v18 = vsel %vm1077_vm3, %v1061_v50, %v1064_v12 }
 0x150   : > { %v1104_v31 = vshll.u32 %v1100_v4, 16  ;;  %v1126_v54 = vshll.u32 %v1122_v53, 16  ;;  %vm1128_vm15 = vc.u32 %v1120_v61, %v1124_v6  ;;  %v1082_v51 = vsel %vm1080_vm9, %v1070_v17, 2102212464 }
 0x151   : > { %v1011_v13 = vmul.f32 %v1010_v23, %v1008_v26  ;;  %vm1106_vm0 = vc.u32 %v1098_v39, %v1102_v52  ;;  %v1108_v48 = vadd.s32 %v1102_v52, %v1098_v39  ;;  %v1129_v45 = vsel %vm1128_vm15, 1, %v3030_v0 }
 0x152   : > { %v1107_v25 = vsel %vm1106_vm0, 1, %v3030_v0  ;;  %v1130_v2 = vadd.s32 %v1124_v6, %v1120_v61  ;;  %v1131_v35 = vadd.s32 %v1129_v45, %v1123_v14  ;;  %v1103_v40 = vshrl.u32 %v1099_v33, 16 }
 0x153   : > { %v1012_v27 = vxor.u32 2147483648, %v1011_v13  ;;  %v1109_v47 = vadd.s32 %v1107_v25, %v1101_v41  ;;  %vm1110_vm1 = vc.u32 %v1108_v48, %v1104_v31  ;;  %v1125_v50 = vshrl.u32 %v1121_v38, 16 }
 0x154   : > { %v1111_v12 = vsel %vm1110_vm1, 1, %v3030_v0  ;;  %vm1132_vm2 = vc.u32 %v1130_v2, %v1126_v54  ;;  %v1203_v26 = vand.u32 2139095040, %v2424_v1  ;;  %v1105_v23 = vshrl.u32 %v1100_v4, 16 }
 0x155   : > { %v1013_v39 = vsel %vm892_vm13, %v1012_v27, %v1011_v13  ;;  %v1113_v52 = vadd.s32 %v1111_v12, %v1109_v47  ;;  %v1133_v17 = vsel %vm1132_vm2, 1, %v3030_v0  ;;  %v1127_v61 = vshrl.u32 %v1122_v53, 16 }
 0x156   : > { %v2557_v45 = vsel %vm2537_vm14, %v2133_v7, %v1013_v39  ;;  %v1135_v31 = vadd.s32 %v1133_v17, %v1131_v35  ;;  %v1204_v33 = vshrl.u32 %v1203_v26, 23  ;;  %v1083_v14 = vsel %vm1079_vm12, %v2486_v10, %v1082_v51 }
 0x157   : > { %v1018_v38 = vmul.f32 %v2557_v45, %v2557_v45  ;;  %v1114_v6 = vadd.s32 %v1113_v52, %v1103_v40  ;;  %v1134_v4 = vadd.s32 %v1130_v2, %v1126_v54  ;;  %v1015_v47 = vsel %vm892_vm13, %v1014_v32, %v2431_v21 }
 0x158   : > { %v1136_v41 = vadd.s32 %v1135_v31, %v1125_v50  ;;  %v1669_v13 = vadd.s32 4294967169, %v1204_v33  ;;  %v1207_v53 = vand.u32 8388607, %v3029_v55  ;;  %v712_v48 = vadd.f32 -0.4999988, %v2493_v46 }
 0x159   : > { %v1019_v25 = vmul.f32 -0.001358992, %v1018_v38  ;;  %v1026_v35 = vmul.f32 -0.00019511016, %v1018_v38  ;;  %v1115_v27 = vadd.s32 %v1114_v6, %v1105_v23  ;;  %v721_v12 = vadd.f32 1.0, %v2496_v5 }
 0x15a   : > { %v1084_v10 = vsel %vm1078_vm11, %v1081_v18, %v1083_v14  ;;  %v1137_v54 = vadd.s32 %v1136_v41, %v1127_v61  ;;  %v1210_v51 = vadd.s32 1, %v1669_v13  ;;  %v1017_v21 = vsel %vm2537_vm14, 0, %v1015_v47 }
 0x15b   : > { %v1020_v32 = vadd.f32 0.041655596, %v1019_v25  ;;  %v1027_v2 = vadd.f32 0.008332121, %v1026_v35  ;;  %vm1140_vm5 = vc.u32 %v1115_v27, %v1134_v4  ;;  %v872_v40 = vadd.f32 0.008332121, %v2528_v34 }
 0x15c   : > { %v1141_v50 = vadd.s32 1, %v1137_v54  ;;  %v1208_v46 = vor.u32 8388608, %v1207_v53  ;;  %vm1211_vm8 = vcmp.gt.s32.totalorder %v1210_v51, 0  ;;  %v1138_v5 = vmul.u32 %v2499_v43, %v1084_v10 }
 0x15d   : > { %v1021_v26 = vmul.f32 %v1020_v32, %v1018_v38  ;;  %v1028_v39 = vmul.f32 %v1027_v2, %v1018_v38  ;;  %v1212_v23 = vsel %vm1211_vm8, %v1210_v51, 0  ;;  %v1034_v24 = vadd.s32 3, %v1017_v21 }
 0x15e   : > { %v1142_v18 = vsel %vm1140_vm5, %v1141_v50, %v1137_v54  ;;  %v1214_v52 = vand.u32 31, %v1212_v23  ;;  %v1358_v17 = vand.u32 2139095040, %v1928_v44  ;;  %v2582_v8 = vadd.s32 3, %v707_v60 }
 0x15f   : > { %v1022_v34 = vadd.f32 -0.4999988, %v1021_v26  ;;  %v1029_v61 = vadd.f32 -0.16666654, %v1028_v39  ;;  %v1143_v31 = vadd.s32 %v1142_v18, %v1138_v5  ;;  %v2585_v33 = vmul.f32 %v712_v48, %v2413_v58 }
 0x160   : > { %v1215_v14 = vsub.s32 32, %v1214_v52  ;;  %v2588_v6 = vshll.u32 %v1208_v46, 8  ;;  %v2591_v47 = vmul.f32 %v721_v12, %v2395_v42  ;;  %v2594_v16 = vmul.f32 -0.001358992, %v2503_v57 }
 0x161   : > { %v2597_v49 = vmul.f32 %v872_v40, %v2503_v57  ;;  %v1144_v60 = vadd.s32 536870912, %v1143_v31  ;;  %v1030_v41 = vmul.f32 %v1029_v61, %v1018_v38  ;;  %v2599_v13 = vand.u32 3, %v1034_v24 }
 0x162   : > { %v3032_v58 = vand.u32 2147483647, %v1928_v44  ;;  %v1359_v53 = vshrl.u32 %v1358_v17, 23  ;;  %v1023_v48 = vmul.f32 %v1022_v34, %v1018_v38  ;;  %v3061_v35 = vmov 2475754826  }
 0x163   : > { %v1145_v25 = vshrl.u32 %v1144_v60, 30  ;;  %v1218_v10 = vshrl.u32 %v3061_v35, %v1215_v14  ;;  %v1221_v42 = vshrl.u32 %v3053_v20, %v1215_v14  ;;  %v2604_v12 = vadd.s32 %v1134_v4, %v1115_v27 }
 0x164   : > { %v2606_v54 = vshrl.u32 %v1212_v23, 5  ;;  %v1227_v51 = vshrl.u32 %v3054_v56, %v1215_v14  ;;  %v2610_v21 = vand.u32 65535, %v2588_v6  ;;  %vm1047_vm10 = vcmp.lt.s32.totalorder %v2184_v29, 0 }
 0x165   : > { %v1146_v32 = vshll.u32 %v1145_v25, 30  ;;  %v3062_v2 = vmov 683565275   ;;  %v1220_v38 = vshll.u32 %v3061_v35, %v1214_v52  ;;  %v3063_v50 = vmov 2102212464  }
 0x166   : > { %v1217_v40 = vshll.u32 %v3062_v2, %v1214_v52  ;;  %v1224_v46 = vshrl.u32 %v3063_v50, %v1215_v14  ;;  %v1031_v26 = vadd.f32 1.0, %v1030_v41  ;;  %vm1040_vm3 = vcmp.eq.s32.totalorder %v2599_v13, 2 }
 0x167   : > { %v1223_v4 = vshll.u32 %v3053_v20, %v1214_v52  ;;  %v1226_v27 = vshll.u32 %v3063_v50, %v1214_v52  ;;  %v1230_v39 = vshrl.u32 %v3055_v59, %v1215_v14  ;;  %v2620_v5 = vadd.f32 1.0, %v1023_v48 }
 0x168   : > { %v1147_v23 = vsub.s32 %v1143_v31, %v1146_v32  ;;  %v1219_v24 = vor.u32 %v1218_v10, %v1217_v40  ;;  %v1222_v18 = vor.u32 %v1221_v42, %v1220_v38  ;;  %v3064_v17 = vand.u32 2147483647, %v2184_v29 }
 0x169   : > { %v1228_v61 = vor.u32 %v1227_v51, %v1226_v27  ;;  %v1229_v60 = vshll.u32 %v3054_v56, %v1214_v52  ;;  %v1250_v41 = vshrl.u32 %v2588_v6, 16  ;;  %v1672_v55 = vadd.s32 4294967169, %v1359_v53 }
 0x16a   : > { %vm2624_vm9 = vcmp.le.f32.partialorder %v3064_v17, 0.7853982  ;;  %vm1148_vm4 = vcmp.lt.s32.totalorder %v1147_v23, 0  ;;  %v1149_v43 = vsub.s32 0, %v1147_v23  ;;  %v1225_v0 = vor.u32 %v1224_v46, %v1223_v4 }
 0x16b   : > { %v2632_v31 = vand.u32 8388607, %v3032_v58  ;;  %v2635_v48 = vmul.f32 %v1031_v26, %v2557_v45  ;;  %v1169_v10 = vsub.s32 4, %v1145_v25  ;;  %v1231_v42 = vor.u32 %v1230_v39, %v1229_v60 }
 0x16c   : > { %vm1232_vm11 = vcmp.lt.s32.totalorder %v2606_v54, 1  ;;  %v1041_v51 = vxor.u32 2147483648, %v2620_v5  ;;  %v1150_v52 = vsel %vm1148_vm4, %v1149_v43, %v1147_v23  ;;  %vm1235_vm12 = vcmp.lt.s32.totalorder %v2606_v54, 4 }
 0x16d   : > { %v1240_v53 = vsel %vm1232_vm11, %v1219_v24, %v1222_v18  ;;  %v1151_v32 = vclz %v1150_v52  ;;  %vm1234_vm13 = vcmp.lt.s32.totalorder %v2606_v54, 3  ;;  %v1241_v40 = vsel %vm1235_vm12, %v1228_v61, 920167782 }
 0x16e   : > { %v1365_v45 = vadd.s32 1, %v1672_v55  ;;  %v1216_v38 = vshrl.u32 %v3062_v2, %v1215_v14  ;;  %vm1233_vm14 = vcmp.lt.s32.totalorder %v2606_v54, 2  ;;  %v1242_v46 = vsel %vm1234_vm13, %v1225_v0, %v1241_v40 }
 0x16f   : > { %v1244_v43 = vsel %vm1232_vm11, %v1222_v18, %v1225_v0  ;;  %v1667_v26 = vadd.s32 4294967294, %v1151_v32  ;;  %v2653_v4 = vsel %vm1047_vm10, %v1169_v10, %v1145_v25  ;;  %v1243_v27 = vsel %vm1233_vm14, %v1240_v53, %v1242_v46 }
 0x170   : > { %v1245_v55 = vsel %vm1235_vm12, %v1231_v42, 1326507024  ;;  %v1038_v14 = vxor.u32 2147483648, %v2635_v48  ;;  %v2663_v39 = vsel %vm1040_vm3, %v1041_v51, %v2635_v48  ;;  %v1274_v60 = vshrl.u32 %v1243_v27, 16 }
 0x171   : > { %v1246_v17 = vsel %vm1234_vm13, %v1228_v61, %v1245_v55  ;;  %vm1668_vm15 = vcmp.lt.s32.totalorder %v1667_v26, 0  ;;  %v1237_v25 = vsel %vm1235_vm12, %v1225_v0, 2102212464  ;;  %v1273_v52 = vand.u32 65535, %v1243_v27 }
 0x172   : > { %v1247_v10 = vsel %vm1233_vm14, %v1244_v43, %v1246_v17  ;;  %v1154_v42 = vsel %vm1668_vm15, 0, %v1667_v26  ;;  %v1236_v61 = vsel %vm1232_vm11, %v1216_v38, %v1219_v24  ;;  %v1276_v46 = vmul.u32 %v1274_v60, %v2610_v21 }
 0x173   : > { %v1251_v32 = vand.u32 65535, %v1247_v10  ;;  %v1252_v48 = vshrl.u32 %v1247_v10, 16  ;;  %v1155_v51 = vsub.s32 32, %v1154_v42  ;;  %v1159_v40 = vsub.s32 4294967266, %v1154_v42 }
 0x174   : > { %vm1037_vm0 = vcmp.eq.s32.totalorder %v2599_v13, 0  ;;  %v1238_v0 = vsel %vm1234_vm13, %v1222_v18, %v1237_v25  ;;  %vm1366_vm1 = vcmp.gt.s32.totalorder %v1365_v45, 0  ;;  %v1156_v27 = vshll.u32 %v1147_v23, %v1154_v42 }
 0x175   : > { %v1254_v43 = vmul.u32 %v1252_v48, %v2610_v21  ;;  %v1255_v26 = vmul.u32 %v1251_v32, %v1250_v41  ;;  %v1157_v55 = vshrl.u32 %v2604_v12, %v1155_v51  ;;  %v1160_v17 = vadd.s32 127, %v1159_v40 }
 0x176   : > { %v1277_v10 = vmul.u32 %v1273_v52, %v1250_v41  ;;  %v1253_v58 = vmul.u32 %v1251_v32, %v2610_v21  ;;  %v1256_v53 = vmul.u32 %v1252_v48, %v1250_v41  ;;  %v1275_v38 = vmul.u32 %v1273_v52, %v2610_v21 }
 0x177   : > { %v1257_v24 = vshll.u32 %v1254_v43, 16  ;;  %v1158_v44 = vor.u32 %v1157_v55, %v1156_v27  ;;  %v1161_v28 = vshll.u32 %v1160_v17, 23  ;;  %v1278_v36 = vmul.u32 %v1274_v60, %v1250_v41 }
 0x178   : > { %v1279_v63 = vshll.u32 %v1276_v46, 16  ;;  %v1259_v18 = vshll.u32 %v1255_v26, 16  ;;  %v1281_v30 = vshll.u32 %v1277_v10, 16  ;;  %v3067_v42 = vmov 0  }
 0x179   : > { %vm1261_vm2 = vc.u32 %v1253_v58, %v1257_v24  ;;  %v1263_v25 = vadd.s32 %v1257_v24, %v1253_v58  ;;  %v1162_v62 = vor.u32 4788187, %v1161_v28  ;;  %v1165_v23 = vcvt.s32.f32 %v1158_v44 }
 0x17a   : > { %v1262_v12 = vsel %vm1261_vm2, 1, %v3067_v42  ;;  %vm1283_vm5 = vc.u32 %v1275_v38, %v1279_v63  ;;  %v1285_v48 = vadd.s32 %v1279_v63, %v1275_v38  ;;  %v1367_v41 = vsel %vm1366_vm1, %v1365_v45, 0 }
 0x17b   : > { %v1264_v51 = vadd.s32 %v1262_v12, %v1256_v53  ;;  %vm1265_vm8 = vc.u32 %v1263_v25, %v1259_v18  ;;  %v1284_v32 = vsel %vm1283_vm5, 1, %v3067_v42  ;;  %v1163_v40 = vand.u32 2147483647, %v1162_v62 }
 0x17c   : > { %v1266_v21 = vsel %vm1265_vm8, 1, %v3067_v42  ;;  %v1286_v52 = vadd.s32 %v1284_v32, %v1278_v36  ;;  %v1239_v58 = vsel %vm1233_vm14, %v1236_v61, %v1238_v0  ;;  %v1258_v60 = vshrl.u32 %v1254_v43, 16 }
 0x17d   : > { %v1268_v28 = vadd.s32 %v1266_v21, %v1264_v51  ;;  %vm1287_vm3 = vc.u32 %v1285_v48, %v1281_v30  ;;  %v2693_v44 = vsel %vm1037_vm0, %v2620_v5, %v1038_v14  ;;  %v1166_v53 = vmul.f32 %v1165_v23, %v1163_v40 }
 0x17e   : > { %v1288_v63 = vsel %vm1287_vm3, 1, %v3067_v42  ;;  %v1369_v62 = vand.u32 31, %v1367_v41  ;;  %v1260_v27 = vshrl.u32 %v1255_v26, 16  ;;  %v1280_v36 = vshrl.u32 %v1276_v46, 16 }
 0x17f   : > { %v1269_v55 = vadd.s32 %v1268_v28, %v1258_v60  ;;  %v1290_v17 = vadd.s32 %v1288_v63, %v1286_v52  ;;  %v1167_v45 = vxor.u32 2147483648, %v1166_v53  ;;  %v1282_v24 = vshrl.u32 %v1277_v10, 16 }
 0x180   : > { %v1293_v54 = vmul.u32 %v2588_v6, %v1239_v58  ;;  %v2697_v61 = vsub.s32 32, %v1369_v62  ;;  %v2701_v43 = vadd.s32 %v1285_v48, %v1281_v30  ;;  %v2703_v14 = vshrl.u32 %v1367_v41, 5 }
 0x181   : > { %v2699_v0 = vadd.s32 %v1269_v55, %v1260_v27  ;;  %v1291_v5 = vadd.s32 %v1290_v17, %v1280_v36  ;;  %v1168_v38 = vsel %vm1047_vm10, %v1167_v45, %v1166_v53  ;;  %v1372_v26 = vshll.u32 %v3062_v2, %v1369_v62 }
 0x182   : > { %v1373_v46 = vshrl.u32 %v3061_v35, %v2697_v61  ;;  %v1376_v6 = vshrl.u32 %v3053_v20, %v2697_v61  ;;  %v2715_v10 = vsel %vm2624_vm9, %v2184_v29, %v1168_v38  ;;  %v1375_v18 = vshll.u32 %v3061_v35, %v1369_v62 }
 0x183   : > { %v1292_v30 = vadd.s32 %v1291_v5, %v1282_v24  ;;  %v1378_v25 = vshll.u32 %v3053_v20, %v1369_v62  ;;  %vm1036_vm10 = vcmp.lt.s32.totalorder %v2599_v13, 2  ;;  %v1173_v23 = vmul.f32 %v2715_v10, %v2715_v10 }
 0x184   : > { %vm1295_vm4 = vc.u32 %v2699_v0, %v2701_v43  ;;  %v1379_v12 = vshrl.u32 %v3063_v50, %v2697_v61  ;;  %v1381_v51 = vshll.u32 %v3063_v50, %v1369_v62  ;;  %v1382_v48 = vshrl.u32 %v3054_v56, %v2697_v61 }
 0x185   : > { %v1296_v32 = vadd.s32 1, %v1292_v30  ;;  %v1384_v35 = vshll.u32 %v3054_v56, %v1369_v62  ;;  %v1385_v20 = vshrl.u32 %v3055_v59, %v2697_v61  ;;  %v1174_v40 = vmul.f32 -0.001358992, %v1173_v23 }
 0x186   : > { %v1181_v21 = vmul.f32 -0.00019511016, %v1173_v23  ;;  %v2732_v52 = vor.u32 %v1373_v46, %v1372_v26  ;;  %v2734_v41 = vor.u32 %v1376_v6, %v1375_v18  ;;  %vm1033_vm11 = vweird.f32 %v2133_v7 }
 0x187   : > { %v1297_v58 = vsel %vm1295_vm4, %v1296_v32, %v1292_v30  ;;  %v1380_v60 = vor.u32 %v1379_v12, %v1378_v25  ;;  %v1383_v50 = vor.u32 %v1382_v48, %v1381_v51  ;;  %v1386_v28 = vor.u32 %v1385_v20, %v1384_v35 }
 0x188   : > { %v1175_v53 = vadd.f32 0.041655596, %v1174_v40  ;;  %v1182_v63 = vadd.f32 0.008332121, %v1181_v21  ;;  %v1298_v27 = vadd.s32 %v1297_v58, %v1293_v54  ;;  %vm1390_vm12 = vcmp.lt.s32.totalorder %v2703_v14, 4 }
 0x189   : > { %v1363_v56 = vor.u32 8388608, %v2632_v31  ;;  %vm1387_vm13 = vcmp.lt.s32.totalorder %v2703_v14, 1  ;;  %vm1389_vm14 = vcmp.lt.s32.totalorder %v2703_v14, 3  ;;  %v1396_v59 = vsel %vm1390_vm12, %v1383_v50, 920167782 }
 0x18a   : > { %v1176_v62 = vmul.f32 %v1175_v53, %v1173_v23  ;;  %v1183_v55 = vmul.f32 %v1182_v63, %v1173_v23  ;;  %v1299_v36 = vadd.s32 536870912, %v1298_v27  ;;  %v1395_v17 = vsel %vm1387_vm13, %v2732_v52, %v2734_v41 }
 0x18b   : > { %v3068_v45 = vsel %vm2624_vm9, 0, %v2653_v4  ;;  %vm1388_vm15 = vcmp.lt.s32.totalorder %v2703_v14, 2  ;;  %v1397_v24 = vsel %vm1389_vm14, %v1380_v60, %v1396_v59  ;;  %v1400_v54 = vsel %vm1390_vm12, %v1386_v28, 1326507024 }
 0x18c   : > { %v1189_v31 = vadd.s32 3, %v3068_v45  ;;  %v1177_v5 = vadd.f32 -0.4999988, %v1176_v62  ;;  %v1184_v38 = vadd.f32 -0.16666654, %v1183_v55  ;;  %v2756_v26 = vshrl.u32 %v1299_v36, 30 }
 0x18d   : > { %v1399_v46 = vsel %vm1387_vm13, %v2734_v41, %v1380_v60  ;;  %v1043_v34 = vsel %vm1036_vm10, %v2693_v44, %v2663_v39  ;;  %v1398_v4 = vsel %vm1388_vm15, %v1395_v17, %v1397_v24  ;;  %v1401_v6 = vsel %vm1389_vm14, %v1383_v50, %v1400_v54 }
 0x18e   : > { %v2769_v30 = vshll.u32 %v1363_v56, 8  ;;  %v3069_v18 = vsub.s32 4, %v2305_v9  ;;  %v1178_v12 = vmul.f32 %v1177_v5, %v1173_v23  ;;  %v1185_v51 = vmul.f32 %v1184_v38, %v1173_v23 }
 0x18f   : > { %v1301_v13 = vshll.u32 %v2756_v26, 30  ;;  %v2780_v39 = vadd.f32 0.041655596, %v2594_v16  ;;  %v2783_v44 = vadd.f32 -0.16666654, %v2597_v49  ;;  %v2785_v32 = vand.u32 3, %v1189_v31 }
 0x190   : > { %v2776_v25 = vsel %vm737_vm7, %v3069_v18, %v2305_v9  ;;  %v1402_v48 = vsel %vm1388_vm15, %v1399_v46, %v1401_v6  ;;  %v2791_v35 = vsel %vm1033_vm11, nan, %v1043_v34  ;;  %v1186_v9 = vadd.f32 1.0, %v1185_v51 }
 0x191   : > { %v2793_v20 = vsub.s32 %v1298_v27, %v1301_v13  ;;  %v1429_v23 = vshrl.u32 %v1398_v4, 16  ;;  %v1179_v40 = vadd.f32 1.0, %v1178_v12  ;;  %v1404_v16 = vand.u32 65535, %v2769_v30 }
 0x192   : > { %v1406_v21 = vand.u32 65535, %v1402_v48  ;;  %v1407_v58 = vshrl.u32 %v1402_v48, 16  ;;  %v1405_v50 = vshrl.u32 %v2769_v30, 16  ;;  %v1428_v28 = vand.u32 65535, %v1398_v4 }
 0x193   : > { %vm1303_vm7 = vcmp.lt.s32.totalorder %v2793_v20, 0  ;;  %v1304_v49 = vsub.s32 0, %v2793_v20  ;;  %v1187_v7 = vmul.f32 %v1186_v9, %v2715_v10  ;;  %vm1192_vm9 = vcmp.eq.s32.totalorder %v2785_v32, 0 }
 0x194   : > { %vm1195_vm0 = vcmp.eq.s32.totalorder %v2785_v32, 2  ;;  %v1409_v53 = vmul.u32 %v1407_v58, %v1404_v16  ;;  %v1371_v27 = vshrl.u32 %v3062_v2, %v2697_v61  ;;  %v1410_v56 = vmul.u32 %v1406_v21, %v1405_v50 }
 0x195   : > { %v1305_v63 = vsel %vm1303_vm7, %v1304_v49, %v2793_v20  ;;  %v1431_v59 = vmul.u32 %v1429_v23, %v1404_v16  ;;  %v1196_v62 = vxor.u32 2147483648, %v1179_v40  ;;  %v1294_v55 = vadd.s32 %v2701_v43, %v2699_v0 }
 0x196   : > { %v1306_v36 = vclz %v1305_v63  ;;  %v1412_v17 = vshll.u32 %v1409_v53, 16  ;;  %v2810_v10 = vsel %vm1387_vm13, %v1371_v27, %v2732_v52  ;;  %v1392_v45 = vsel %vm1390_vm12, %v1380_v60, 2102212464 }
 0x197   : > { %v1408_v31 = vmul.u32 %v1406_v21, %v1404_v16  ;;  %v1430_v24 = vmul.u32 %v1428_v28, %v1404_v16  ;;  %vm1191_vm1 = vcmp.lt.s32.totalorder %v2785_v32, 2  ;;  %v1193_v2 = vxor.u32 2147483648, %v1187_v7 }
 0x198   : > { %v1670_v61 = vadd.s32 4294967294, %v1306_v36  ;;  %v1411_v54 = vmul.u32 %v1407_v58, %v1405_v50  ;;  %v1432_v5 = vmul.u32 %v1428_v28, %v1405_v50  ;;  %v1414_v0 = vshll.u32 %v1410_v56, 16 }
 0x199   : > { %vm1416_vm2 = vc.u32 %v1408_v31, %v1412_v17  ;;  %v1418_v43 = vadd.s32 %v1412_v17, %v1408_v31  ;;  %v1434_v38 = vshll.u32 %v1431_v59, 16  ;;  %v1197_v52 = vsel %vm1195_vm0, %v1196_v62, %v1187_v7 }
 0x19a   : > { %vm1671_vm5 = vcmp.lt.s32.totalorder %v1670_v61, 0  ;;  %v1417_v46 = vsel %vm1416_vm2, 1, %v3067_v42  ;;  %v1433_v60 = vmul.u32 %v1429_v23, %v1405_v50  ;;  %v1413_v4 = vshrl.u32 %v1409_v53, 16 }
 0x19b   : > { %v1309_v34 = vsel %vm1671_vm5, 0, %v1670_v61  ;;  %v1419_v6 = vadd.s32 %v1417_v46, %v1411_v54  ;;  %vm1420_vm8 = vc.u32 %v1418_v43, %v1414_v0  ;;  %vm1188_vm3 = vweird.f32 %v2184_v29 }
 0x19c   : > { %v1194_v18 = vsel %vm1192_vm9, %v1179_v40, %v1193_v2  ;;  %v1310_v12 = vsub.s32 32, %v1309_v34  ;;  %v1314_v51 = vsub.s32 4294967266, %v1309_v34  ;;  %v1421_v13 = vsel %vm1420_vm8, 1, %v3067_v42 }
 0x19d   : > { %v1423_v48 = vadd.s32 %v1421_v13, %v1419_v6  ;;  %v1436_v9 = vshll.u32 %v1432_v5, 16  ;;  %vm1438_vm10 = vc.u32 %v1430_v24, %v1434_v38  ;;  %v1440_v16 = vadd.s32 %v1434_v38, %v1430_v24 }
 0x19e   : > { %v1311_v23 = vshll.u32 %v2793_v20, %v1309_v34  ;;  %v1312_v21 = vshrl.u32 %v1294_v55, %v1310_v12  ;;  %v1315_v58 = vadd.s32 127, %v1314_v51  ;;  %v1439_v49 = vsel %vm1438_vm10, 1, %v3067_v42  ;;  %v3073_v12 = vld [vmem:[#allocation9_spill] sm:$0xff] }
 0x19f   : > { %v1415_v50 = vshrl.u32 %v1410_v56, 16  ;;  %v1424_v28 = vadd.s32 %v1423_v48, %v1413_v4  ;;  %v1441_v40 = vadd.s32 %v1439_v49, %v1433_v60  ;;  %vm1442_vm4 = vc.u32 %v1440_v16, %v1436_v9  ;;  %v2839_v56 = vld [vmem:[%s3011_s1] sm:$0xff] }
 0x1a0   : > { %v1313_v7 = vor.u32 %v1312_v21, %v1311_v23  ;;  %v1316_v53 = vshll.u32 %v1315_v58, 23  ;;  %v1443_v63 = vsel %vm1442_vm4, 1, %v3067_v42  ;;  %v1524_v27 = vperm.slane %v2791_v35, 0  ;;  %v2844_v42 = vld [vmem:[%s3011_s1 + $0x8] sm:$0xff] }
 0x1a1   : > { %v1198_v62 = vsel %vm1191_vm1, %v1194_v18, %v1197_v52  ;;  %v1393_v20 = vsel %vm1389_vm14, %v2734_v41, %v1392_v45  ;;  %v1435_v55 = vshrl.u32 %v1431_v59, 16  ;;  %v1445_v36 = vadd.s32 %v1443_v63, %v1441_v40  ;;  %v3074_v23 = vld [vmem:[#allocation6_spill] sm:$0xff] }
 0x1a2   : > { %v1317_v35 = vor.u32 4788187, %v1316_v53  ;;  %v2846_v32 = vadd.s32 %v1424_v28, %v1415_v50  ;;  %v1544_v17 = vadd.f32 %v1524_v27, %v2839_v56  ;;  %v1545_v41 = vadd.f32 %v1524_v27, %v2844_v42  ;;  %v3075_v28 = vld [vmem:[#allocation10_spill] sm:$0xff] }
 0x1a3   : > { %v866_v59 = vmul.f32 %v2780_v39, %v2503_v57  ;;  %v1437_v45 = vshrl.u32 %v1432_v5, 16  ;;  %v1446_v31 = vadd.s32 %v1445_v36, %v1435_v55  ;;  %vm1552_vm11 = vcmask 261120  }
 0x1a4   : > { %v875_v24 = vmul.f32 %v2783_v44, %v2503_v57  ;;  %v1318_v2 = vand.u32 2147483647, %v1317_v35  ;;  %v1320_v61 = vcvt.s32.f32 %v1313_v7  ;;  %v2854_v54 = vadd.s32 %v1440_v16, %v1436_v9  ;;  %1561 = vst.msk [vmem:[%s2857_s28 + $0x40] sm:$0xff] %vm1552_vm11, %v1544_v17 }
 0x1a5   : > { %v2863_v0 = vmul.f32 %v2479_v3, %v2341_v22  ;;  %v1199_v39 = vsel %vm1188_vm3, nan, %v1198_v62  ;;  %v1394_v44 = vsel %vm1388_vm15, %v2810_v10, %v1393_v20  ;;  %v1447_v5 = vadd.s32 %v1446_v31, %v1437_v45  ;;  %1562 = vst.msk [vmem:[%s2857_s28 + $0x48] sm:$0xff] %vm1552_vm11, %v1545_v41 }
 0x1a6   : > { %v714_v43 = vadd.f32 1.0, %v2585_v33  ;;  %v725_v38 = vand.u32 3, %v2582_v8  ;;  %v1321_v52 = vmul.f32 %v1320_v61, %v1318_v2  ;;  %vm1450_vm12 = vc.u32 %v2846_v32, %v2854_v54 }
 0x1a7   : > { %v728_v22 = vxor.u32 2147483648, %v2591_v47  ;;  %v862_v29 = vsel %vm2442_vm6, 0, %v2776_v25  ;;  %v867_v3 = vadd.f32 -0.4999988, %v866_v59  ;;  %v1451_v14 = vadd.s32 1, %v1447_v5 }
 0x1a8   : > { %vm572_vm13 = vcmp.eq.s32.totalorder %v2434_v11, 0  ;;  %v876_v10 = vadd.f32 1.0, %v875_v24  ;;  %v1322_v46 = vxor.u32 2147483648, %v1321_v52  ;;  %v1448_v33 = vmul.u32 %v2769_v30, %v1394_v44 }
 0x1a9   : > { %v1525_v60 = vperm.slane %v1199_v39, 0  ;;  %v3070_v8 = vand.u32 2147483647, %v2424_v1  ;;  %vm1202_vm15 = vcmp.lt.s32.totalorder %v2424_v1, 0  ;;  %v1324_v37 = vsub.s32 4, %v2756_v26 }
 0x1aa   : > { %v1452_v25 = vsel %vm1450_vm12, %v1451_v14, %v1447_v5  ;;  %vm413_vm6 = vweird.f32 %v1901_v15  ;;  %v1323_v4 = vsel %vm1202_vm15, %v1322_v46, %v1321_v52  ;;  %v559_v51 = vadd.f32 1.0, %v3073_v12 }
 0x1ab   : > { %vm2884_vm14 = vcmp.le.f32.partialorder %v3070_v8, 0.7853982  ;;  %v1453_v6 = vadd.s32 %v1452_v25, %v1448_v33  ;;  %v1546_v30 = vadd.f32 %v1525_v60, %v2839_v56  ;;  %v1547_v18 = vadd.f32 %v1525_v60, %v2844_v42  ;;  %v3077_v25 = vld [vmem:[#allocation5_spill] sm:$0xff] }
 0x1ac   : > { %v731_v13 = vxor.u32 2147483648, %v714_v43  ;;  %v868_v48 = vmul.f32 %v867_v3, %v2503_v57  ;;  %v1326_v9 = vsel %vm2884_vm14, %v2424_v1, %v1323_v4  ;;  %vm571_vm7 = vcmp.lt.s32.totalorder %v2434_v11, 2 }
 0x1ad   : > { %v573_v16 = vxor.u32 2147483648, %v2863_v0  ;;  %vm723_vm9 = vweird.f32 %v3074_v23  ;;  %vm727_vm0 = vcmp.eq.s32.totalorder %v725_v38, 0  ;;  %v1328_v21 = vmul.f32 %v1326_v9, %v1326_v9  ;;  %1563 = vst.msk [vmem:[%s2857_s28 + $0x50] sm:$0xff] %vm1552_vm11, %v1546_v30 }
 0x1ae   : > { %v1454_v58 = vadd.s32 536870912, %v1453_v6  ;;  %v729_v49 = vsel %vm727_vm0, %v714_v43, %v728_v22  ;;  %vm730_vm1 = vcmp.eq.s32.totalorder %v725_v38, 2  ;;  %v879_v50 = vadd.s32 3, %v862_v29  ;;  %1564 = vst.msk [vmem:[%s2857_s28 + $0x58] sm:$0xff] %vm1552_vm11, %v1547_v18 }
 0x1af   : > { %v1325_v57 = vsel %vm1202_vm15, %v1324_v37, %v2756_v26  ;;  %v877_v40 = vmul.f32 %v876_v10, %v3075_v28  ;;  %v1329_v7 = vmul.f32 -0.001358992, %v1328_v21  ;;  %v1336_v53 = vmul.f32 -0.00019511016, %v1328_v21 }
 0x1b0   : > { %v2911_v63 = vshrl.u32 %v1454_v58, 30  ;;  %v576_v27 = vxor.u32 2147483648, %v559_v51  ;;  %vm726_vm2 = vcmp.lt.s32.totalorder %v725_v38, 2  ;;  %v732_v62 = vsel %vm730_vm1, %v731_v13, %v2591_v47  ;;  %v3076_v47 = vld [vmem:[#allocation8_spill] sm:$0xff] }
 0x1b1   : > { %v869_v20 = vadd.f32 1.0, %v868_v48  ;;  %v1327_v55 = vsel %vm2884_vm14, 0, %v1325_v57  ;;  %v1330_v36 = vadd.f32 0.041655596, %v1329_v7  ;;  %v1337_v35 = vadd.f32 0.008332121, %v1336_v53 }
 0x1b2   : > { %v1456_v26 = vshll.u32 %v2911_v63, 30  ;;  %v574_v17 = vsel %vm572_vm13, %v559_v51, %v573_v16  ;;  %vm575_vm5 = vcmp.eq.s32.totalorder %v2434_v11, 2  ;;  %v733_v41 = vsel %vm726_vm2, %v729_v49, %v732_v62 }
 0x1b3   : > { %v880_v59 = vand.u32 3, %v879_v50  ;;  %v883_v45 = vxor.u32 2147483648, %v877_v40  ;;  %v1331_v31 = vmul.f32 %v1330_v36, %v1328_v21  ;;  %v1338_v24 = vmul.f32 %v1337_v35, %v1328_v21 }
 0x1b4   : > { %v1457_v2 = vsub.s32 %v1453_v6, %v1456_v26  ;;  %v424_v61 = vsel %vm413_vm6, nan, %v3076_v47  ;;  %v577_v39 = vsel %vm575_vm5, %v576_v27, %v2863_v0  ;;  %v886_v44 = vxor.u32 2147483648, %v869_v20 }
 0x1b5   : > { %v1344_v5 = vadd.s32 3, %v1327_v55  ;;  %v1332_v43 = vadd.f32 -0.4999988, %v1331_v31  ;;  %v1339_v38 = vadd.f32 -0.16666654, %v1338_v24  ;;  %v578_v22 = vsel %vm571_vm7, %v574_v17, %v577_v39 }
 0x1b6   : > { %vm1458_vm8 = vcmp.lt.s32.totalorder %v1457_v2, 0  ;;  %v1459_v52 = vsub.s32 0, %v1457_v2  ;;  %v734_v29 = vsel %vm723_vm9, nan, %v733_v41  ;;  %vm882_vm3 = vcmp.eq.s32.totalorder %v880_v59, 0 }
 0x1b7   : > { %vm885_vm10 = vcmp.eq.s32.totalorder %v880_v59, 2  ;;  %v884_v3 = vsel %vm882_vm3, %v869_v20, %v883_v45  ;;  %v1333_v14 = vmul.f32 %v1332_v43, %v1328_v21  ;;  %v1340_v15 = vmul.f32 %v1339_v38, %v1328_v21 }
 0x1b8   : > { %v1460_v10 = vsel %vm1458_vm8, %v1459_v52, %v1457_v2  ;;  %vm881_vm4 = vcmp.lt.s32.totalorder %v880_v59, 2  ;;  %v887_v0 = vsel %vm885_vm10, %v886_v44, %v877_v40  ;;  %v1345_v46 = vand.u32 3, %v1344_v5 }
 0x1b9   : > { %v1461_v33 = vclz %v1460_v10  ;;  %v1334_v60 = vadd.f32 1.0, %v1333_v14  ;;  %v1341_v8 = vadd.f32 1.0, %v1340_v15  ;;  %v1520_v34 = vperm.slane %v424_v61, 0 }
 0x1ba   : > { %v1522_v37 = vperm.slane %v734_v29, 0  ;;  %vm568_vm12 = vweird.f32 %v3077_v25  ;;  %vm878_vm13 = vweird.f32 %v2102_v19  ;;  %v888_v11 = vsel %vm881_vm4, %v884_v3, %v887_v0 }
 0x1bb   : > { %v1673_v4 = vadd.s32 4294967294, %v1461_v33  ;;  %v1342_v6 = vmul.f32 %v1341_v8, %v1326_v9  ;;  %v1351_v30 = vxor.u32 2147483648, %v1334_v60  ;;  %v1536_v18 = vadd.f32 %v1520_v34, %v2839_v56 }
 0x1bc   : > { %v1537_v12 = vadd.f32 %v1520_v34, %v2844_v42  ;;  %v579_v51 = vsel %vm568_vm12, nan, %v578_v22  ;;  %v1540_v13 = vadd.f32 %v1522_v37, %v2839_v56  ;;  %v1541_v48 = vadd.f32 %v1522_v37, %v2844_v42 }
 0x1bd   : > { %vm1674_vm14 = vcmp.lt.s32.totalorder %v1673_v4, 0  ;;  %v889_v16 = vsel %vm878_vm13, nan, %v888_v11  ;;  %vm1347_vm15 = vcmp.eq.s32.totalorder %v1345_v46, 0  ;;  %v1348_v23 = vxor.u32 2147483648, %v1342_v6  ;;  %1553 = vst.msk [vmem:[%s2857_s28] sm:$0xff] %vm1552_vm11, %v1536_v18 }
 0x1be   : > { %v1464_v19 = vsel %vm1674_vm14, 0, %v1673_v4  ;;  %vm1350_vm6 = vcmp.eq.s32.totalorder %v1345_v46, 2  ;;  %v1449_v9 = vadd.s32 %v2854_v54, %v2846_v32  ;;  %1554 = vst.msk [vmem:[%s2857_s28 + $0x8] sm:$0xff] %vm1552_vm11, %v1537_v12  ;;  %vm1343_vm7 = vweird.f32 %v2424_v1 }
 0x1bf   : > { %v1465_v21 = vsub.s32 32, %v1464_v19  ;;  %v1469_v58 = vsub.s32 4294967266, %v1464_v19  ;;  %vm1346_vm9 = vcmp.lt.s32.totalorder %v1345_v46, 2  ;;  %v1349_v49 = vsel %vm1347_vm15, %v1334_v60, %v1348_v23  ;;  %1557 = vst.msk [vmem:[%s2857_s28 + $0x20] sm:$0xff] %vm1552_vm11, %v1540_v13 }
 0x1c0   : > { %v1352_v50 = vsel %vm1350_vm6, %v1351_v30, %v1342_v6  ;;  %v1466_v28 = vshll.u32 %v1457_v2, %v1464_v19  ;;  %1558 = vst.msk [vmem:[%s2857_s28 + $0x28] sm:$0xff] %vm1552_vm11, %v1541_v48  ;;  %v1521_v32 = vperm.slane %v579_v51, 0  ;;  %v1523_v54 = vperm.slane %v889_v16, 0  ;;  %v3078_v2 = vld [vmem:[#allocation7_spill] sm:$0xff] }
 0x1c1   : > { %v1353_v57 = vsel %vm1346_vm9, %v1349_v49, %v1352_v50  ;;  %v1467_v40 = vshrl.u32 %v1449_v9, %v1465_v21  ;;  %v1470_v7 = vadd.s32 127, %v1469_v58  ;;  %vm1357_vm0 = vcmp.lt.s32.totalorder %v3078_v2, 0 }
 0x1c2   : > { %v1354_v53 = vsel %vm1343_vm7, nan, %v1353_v57  ;;  %v1538_v20 = vadd.f32 %v1521_v32, %v2839_v56  ;;  %v1539_v55 = vadd.f32 %v1521_v32, %v2844_v42  ;;  %v1542_v36 = vadd.f32 %v1523_v54, %v2839_v56 }
 0x1c3   : > { %v1468_v27 = vor.u32 %v1467_v40, %v1466_v28  ;;  %v1471_v1 = vshll.u32 %v1470_v7, 23  ;;  %v1526_v62 = vperm.slane %v1354_v53, 0  ;;  %v1543_v26 = vadd.f32 %v1523_v54, %v2844_v42 }
 0x1c4   : > { %1555 = vst.msk [vmem:[%s2857_s28 + $0x10] sm:$0xff] %vm1552_vm11, %v1538_v20  ;;  %v3079_v47 = vand.u32 2147483647, %v3078_v2  ;;  %v1479_v39 = vsub.s32 4, %v2911_v63  ;;  %vm1498_vm3 = vweird.f32 %v3078_v2 }
 0x1c5   : > { %v1472_v35 = vor.u32 4788187, %v1471_v1  ;;  %v1548_v17 = vadd.f32 %v1526_v62, %v2839_v56  ;;  %v1475_v59 = vcvt.s32.f32 %v1468_v27  ;;  %v1549_v45 = vadd.f32 %v1526_v62, %v2844_v42  ;;  %1556 = vst.msk [vmem:[%s2857_s28 + $0x18] sm:$0xff] %vm1552_vm11, %v1539_v55 }
 0x1c6   : > { %1559 = vst.msk [vmem:[%s2857_s28 + $0x30] sm:$0xff] %vm1552_vm11, %v1542_v36  ;;  %vm1356_vm1 = vcmp.le.f32.partialorder %v3079_v47, 0.7853982  ;;  %v1480_v52 = vsel %vm1357_vm0, %v1479_v39, %v2911_v63 }
 0x1c7   : > { %v1473_v41 = vand.u32 2147483647, %v1472_v35  ;;  %1560 = vst.msk [vmem:[%s2857_s28 + $0x38] sm:$0xff] %vm1552_vm11, %v1543_v26  ;;  %v1482_v3 = vsel %vm1356_vm1, 0, %v1480_v52 }
 0x1c8   : > { %1565 = vst.msk [vmem:[%s2857_s28 + $0x60] sm:$0xff] %vm1552_vm11, %v1548_v17  ;;  %v1499_v46 = vadd.s32 3, %v1482_v3 }
 0x1c9   : > { %v1476_v31 = vmul.f32 %v1475_v59, %v1473_v41  ;;  %1566 = vst.msk [vmem:[%s2857_s28 + $0x68] sm:$0xff] %vm1552_vm11, %v1549_v45 }
 0x1ca   : > { %v1500_v37 = vand.u32 3, %v1499_v46 }
 0x1cb   : > { %v1477_v24 = vxor.u32 2147483648, %v1476_v31 }
 0x1cc   : > { %vm1502_vm2 = vcmp.eq.s32.totalorder %v1500_v37, 0  ;;  %vm1505_vm5 = vcmp.eq.s32.totalorder %v1500_v37, 2  ;;  %vm1501_vm8 = vcmp.lt.s32.totalorder %v1500_v37, 2 }
 0x1cd   : > { %v1478_v61 = vsel %vm1357_vm0, %v1477_v24, %v1476_v31 }
 0x1ce   : > { %v1481_v44 = vsel %vm1356_vm1, %v3078_v2, %v1478_v61 }
 0x1cf   : > { %v1483_v5 = vmul.f32 %v1481_v44, %v1481_v44 }
 0x1d1   : > { %v1484_v43 = vmul.f32 -0.001358992, %v1483_v5  ;;  %v1491_v38 = vmul.f32 -0.00019511016, %v1483_v5 }
 0x1d3   : > { %v1485_v22 = vadd.f32 0.041655596, %v1484_v43  ;;  %v1492_v29 = vadd.f32 0.008332121, %v1491_v38 }
 0x1d5   : > { %v1486_v14 = vmul.f32 %v1485_v22, %v1483_v5  ;;  %v1493_v15 = vmul.f32 %v1492_v29, %v1483_v5 }
 0x1d7   : > { %v1487_v10 = vadd.f32 -0.4999988, %v1486_v14  ;;  %v1494_v0 = vadd.f32 -0.16666654, %v1493_v15 }
 0x1d9   : > { %v1488_v33 = vmul.f32 %v1487_v10, %v1483_v5  ;;  %v1495_v60 = vmul.f32 %v1494_v0, %v1483_v5 }
 0x1db   : > { %v1489_v8 = vadd.f32 1.0, %v1488_v33  ;;  %v1496_v34 = vadd.f32 1.0, %v1495_v60 }
 0x1dd   : > { %v1497_v25 = vmul.f32 %v1496_v34, %v1481_v44  ;;  %v1506_v11 = vxor.u32 2147483648, %v1489_v8 }
 0x1df   : > { %v1503_v4 = vxor.u32 2147483648, %v1497_v25  ;;  %v1507_v6 = vsel %vm1505_vm5, %v1506_v11, %v1497_v25 }
 0x1e1   : > { %v1504_v63 = vsel %vm1502_vm2, %v1489_v8, %v1503_v4 }
 0x1e2   : > { %v1508_v30 = vsel %vm1501_vm8, %v1504_v63, %v1507_v6 }
 0x1e3   : > { %v1509_v18 = vsel %vm1498_vm3, nan, %v1508_v30 }
 0x1e4   : > { %v1527_v12 = vperm.slane %v1509_v18, 0 }
 0x1e6   : > { %v1550_v51 = vadd.f32 %v1527_v12, %v2839_v56  ;;  %v1551_v13 = vadd.f32 %v1527_v12, %v2844_v42 }
 0x1e8   : > { %1567 = vst.msk [vmem:[%s2857_s28 + $0x70] sm:$0xff] %vm1552_vm11, %v1550_v51 }
 0x1e9   : > { %1568 = vst.msk [vmem:[%s2857_s28 + $0x78] sm:$0xff] %vm1552_vm11, %v1551_v13 }
 0x1ea   : > { %1763 = shalt.err (!%p1760_p3)
}
 0x1eb   : > { %s1807_s13 = smov 128   ;;  %s1808_s23 = smov 8  }
 0x1ec   : > { %1683 = dma.vmem_to_hbm [thread:$0]  (%p1872_p5), %s1584_s7, 2048, %s1586_s19, %s1570_s8, %s1807_s13, %s1807_s13, %s1808_s23  }
 0x1ed PF: > { %p1689_p4 = scmp.ge.s32.totalorder %s1798_s18, 2  ;;  %s1600_s27 = sand.u32 1, %s1786_s15  }
 0x1ee   : > { %s1601_s28 = scalar_lea.sflag [#allocation3], %s1600_s27 }
 0x1ef   : > { %p1686_p7 = pnand %p1689_p4, %p1876_p6 }
 0x1f1   : > { %p1687_p8 = pneg %p1686_p7 }
 0x1f3   : > { %1781 = dma.done.wait (%p1687_p8), %s1601_s28, 2048  }
 0x1f4   : > { %1783 = vsyncadd (%p1687_p8), %s1601_s28, 4294965248  ;;  %p14_p9 = scmp.ge.s32.totalorder %s1859_s21, 4   ;;  %s3080_s15 = smov %s1790_s16 }
 0x1f5   : > { %s3081_s16 = smov %s1794_s17  ;;  %s3082_s17 = smov %s1870_s24 }
 0x1f6   : > { %s3083_s18 = smov %s1859_s21  ;;  %16 = sbr.rel (!%p14_p9) target bundleno = 3 (0x3), region = 71 }
 0x1fb   :  { %1607 = vsyncpa [#allocation3], 1 }
 0x1fc   :  { %1609 = vsyncpa [#allocation3 + $0x1], 1 }

</bundles_post_ra>
